<compile_context>
chip_gen: v5e
topology: v5e:2x2
jax: 0.10.0
libtpu: 0.0.40
codegen_flags: <defaults>
</compile_context>

<pallas_src>
import jax
import jax.numpy as jnp
from jax import lax
from jax.experimental import pallas as pl
from jax.experimental.pallas import tpu as pltpu


def _round_up(x, m):
    return ((x + m - 1) // m) * m


def _pick_batch_tile(b_pad):
    # b_pad is a multiple of 8; pick the largest tile <= 128 that divides it.
    for cand in (128, 64, 32, 16, 8):
        if b_pad % cand == 0:
            return cand
    return b_pad


def _pick_n_tile(n_pad):
    # n_pad is a multiple of 128; pick the largest lane-dense tile that divides it.
    for cand in (512, 256, 128):
        if n_pad % cand == 0:
            return cand
    return n_pad


def _vmem_limit(resident_bytes):
    # 2x headroom for double-buffering / compiler scratch; clamp to v7x 64 MiB.
    return int(min(64 * 1024 * 1024, max(4 * 1024 * 1024, 2 * resident_bytes)))


# --------------------------- kernel 1: recurrence ---------------------------
def gru_recurrence_kernel(len_ref,    # (TB, 1)        f32 sequence lengths
                          emb_ref,    # (Tc, TB, H)    compute_dtype chunk of embeddings
                          wi_ref,     # (H,  3*HP)     compute_dtype, per-gate lane slabs
                          wh_ref,     # (HP, 3*HP)     compute_dtype, per-gate lane slabs
                          bi_ref,     # (1,  3*HP)     f32 [bir+bhr | biz+bhz | bin]
                          bh_ref,     # (1,  3*HP)     f32 [   0    |    0    | bhn]
                          h_out_ref,  # (TB, HP)       f32 final hidden (written on last chunk)
                          gi_ref,     # (Tc, TB, 3*HP) f32 scratch: batched input projection
                          h_ref):     # (TB, HP)       f32 scratch: carried hidden state
    Tc, TB, H = emb_ref.shape
    HP = h_ref.shape[1]
    c = pl.program_id(1)

    @pl.when(c == 0)
    def _():
        h_ref[...] = jnp.zeros_like(h_ref)

    # Batched input projection for the whole chunk: one MXU matmul, off the
    # serial critical path (only h @ Wh remains inside the recurrence).
    x = emb_ref[...].reshape(Tc * TB, H)
    gi = jnp.dot(x, wi_ref[...], preferred_element_type=jnp.float32) + bi_ref[...]
    gi_ref[...] = gi.reshape(Tc, TB, 3 * HP)

    wh = wh_ref[...]
    bh = bh_ref[...]
    lens = len_ref[...]                                      # (TB, 1) f32
    t0 = c * Tc

    h = h_ref[...]                                           # (TB, HP) f32
    # Static Python loop: live ranges are bounded by the T-chunk grid boundary.
    for t in range(Tc):
        gi_t = gi_ref[t]                                     # (TB, 3*HP) f32
        gh = jnp.dot(h.astype(wh.dtype), wh,
                     preferred_element_type=jnp.float32) + bh
        # PyTorch GRU cell, gate order (r, z, n); slabs are 128-lane aligned.
        r = jax.nn.sigmoid(gi_t[:, 0:HP] + gh[:, 0:HP])
        z = jax.nn.sigmoid(gi_t[:, HP:2 * HP] + gh[:, HP:2 * HP])
        n = jnp.tanh(gi_t[:, 2 * HP:3 * HP] + r * gh[:, 2 * HP:3 * HP])
        h_new = (1.0 - z) * n + z * h
        # pack_padded_sequence: freeze h once t >= len_states[b] (lerp, no select).
        m = (lens > (t0 + t).astype(jnp.float32)).astype(jnp.float32)
        h = h + m * (h_new - h)
    h_ref[...] = h

    @pl.when(c == pl.num_programs(1) - 1)
    def _():
        h_out_ref[...] = h


# ------------------------ kernel 2: final linear (FC) -----------------------
def fc_kernel(h_ref, w_ref, b_ref, out_ref):
    out_ref[...] = (jnp.dot(h_ref[...], w_ref[...],
                            preferred_element_type=jnp.float32)
                    + b_ref[...]).astype(out_ref.dtype)


# --------------------------------- wrapper ----------------------------------
def gru_forward_pallas(states, len_states, params, hidden_size, item_num,
                       *, compute_dtype=jnp.float32, t_chunk=None):
    """states: int32 [B, T]; len_states: int32 [B]. Returns logits [B, item_num]."""
    B, T = states.shape
    H = hidden_size
    N = item_num
    HP = _round_up(H, 128)          # per-gate lane-aligned slab width
    GP = 3 * HP                     # fused gate width
    NP = _round_up(N, 128)          # lane-dense logits width

    B_pad = _round_up(B, 8)
    TB = _pick_batch_tile(B_pad)
    Tc = min(T, 16) if t_chunk is None else t_chunk
    T_pad = _round_up(T, Tc)
    isz = jnp.dtype(compute_dtype).itemsize

    # ---- glue (plain JAX): embedding gather, padding, fused/padded weights ----
    emb = jnp.take(params["item_emb"], states, axis=0).astype(compute_dtype)   # [B,T,H]
    emb_tm = jnp.transpose(emb, (1, 0, 2))                                      # [T,B,H]
    emb_tm = jnp.pad(emb_tm, ((0, T_pad - T), (0, B_pad - B), (0, 0)))

    lens = jnp.pad(len_states.astype(jnp.float32), (0, B_pad - B))[:, None]     # [B_pad,1]

    w_ih, w_hh = params["w_ih"], params["w_hh"]      # [3H, H], gate order (r|z|n)
    b_ih, b_hh = params["b_ih"], params["b_hh"]      # [3H]

    # Each gate gets its own 128-lane-aligned slab; padded columns/rows are zero,
    # which keeps the padded lanes of h identically zero through the recurrence.
    wi = jnp.zeros((H, GP), compute_dtype)
    wh = jnp.zeros((HP, GP), compute_dtype)
    for g in range(3):
        wi = wi.at[:, g * HP:g * HP + H].set(w_ih[g * H:(g + 1) * H, :].T.astype(compute_dtype))
        wh = wh.at[:H, g * HP:g * HP + H].set(w_hh[g * H:(g + 1) * H, :].T.astype(compute_dtype))

    # r/z biases are summed before the sigmoid -> fold bh_r/bh_z into bi; the
    # n-gate hidden bias stays on the gh side (it is scaled by r).
    bi = jnp.zeros((1, GP), jnp.float32)
    bi = bi.at[0, 0:H].set(b_ih[0:H] + b_hh[0:H])
    bi = bi.at[0, HP:HP + H].set(b_ih[H:2 * H] + b_hh[H:2 * H])
    bi = bi.at[0, 2 * HP:2 * HP + H].set(b_ih[2 * H:3 * H])
    bh = jnp.zeros((1, GP), jnp.float32).at[0, 2 * HP:2 * HP + H].set(b_hh[2 * H:3 * H])

    # ---- kernel 1: GRU recurrence (batch-parallel, T-chunked) ----
    grid = (B_pad // TB, T_pad // Tc)
    vmem1 = _vmem_limit(
        2 * (Tc * TB * H * isz            # emb chunk (double-buffered)
             + TB * 128 * 4               # lengths (lane-padded)
             + H * GP * isz + HP * GP * isz
             + 2 * GP * 4
             + TB * HP * 4)               # output hidden block
        + Tc * TB * GP * 4 + TB * HP * 4)  # scratch

    hT = pl.pallas_call(
        gru_recurrence_kernel,
        out_shape=jax.ShapeDtypeStruct((B_pad, HP), jnp.float32),
        grid_spec=pltpu.PrefetchScalarGridSpec(
            num_scalar_prefetch=0,
            grid=grid,
            in_specs=[
                pl.BlockSpec((TB, 1), lambda b, c: (b, 0)),           # lengths
                pl.BlockSpec((Tc, TB, H), lambda b, c: (c, b, 0)),    # emb chunk
                pl.BlockSpec((H, GP), lambda b, c: (0, 0)),           # wi
                pl.BlockSpec((HP, GP), lambda b, c: (0, 0)),          # wh
                pl.BlockSpec((1, GP), lambda b, c: (0, 0)),           # bi
                pl.BlockSpec((1, GP), lambda b, c: (0, 0)),           # bh
            ],
            out_specs=pl.BlockSpec((TB, HP), lambda b, c: (b, 0)),
            scratch_shapes=[pltpu.VMEM((Tc, TB, GP), jnp.float32),
                            pltpu.VMEM((TB, HP), jnp.float32)]),
        compiler_params=pltpu.CompilerParams(
            dimension_semantics=("parallel", "arbitrary"),
            vmem_limit_bytes=vmem1),
    )(lens, emb_tm, wi, wh, bi, bh)

    # ---- kernel 2: final linear layer, streamed over the item dimension ----
    tn = _pick_n_tile(NP)
    wfc = jnp.zeros((HP, NP), compute_dtype).at[:H, :N].set(
        params["w_fc"].T.astype(compute_dtype))
    bfc = jnp.zeros((1, NP), jnp.float32).at[0, :N].set(params["b_fc"])
    h_in = hT.astype(compute_dtype)

    vmem2 = _vmem_limit(
        2 * (B_pad * HP * isz + HP * tn * isz + tn * 4 + B_pad * tn * 4))

    out_padded = pl.pallas_call(
        fc_kernel,
        out_shape=jax.ShapeDtypeStruct((B_pad, NP), jnp.float32),
        grid_spec=pltpu.PrefetchScalarGridSpec(
            num_scalar_prefetch=0,
            grid=(NP // tn,),
            in_specs=[
                pl.BlockSpec((B_pad, HP), lambda j: (0, 0)),
                pl.BlockSpec((HP, tn), lambda j: (0, j)),
                pl.BlockSpec((1, tn), lambda j: (0, j)),
            ],
            out_specs=pl.BlockSpec((B_pad, tn), lambda j: (0, j))),
        compiler_params=pltpu.CompilerParams(
            dimension_semantics=("parallel",),
            vmem_limit_bytes=vmem2),
    )(h_in, wfc, bfc)

    # TODO(synk): for very large B, tile the FC over the batch as well.
    return out_padded[:B, :N]


# ---------------- pure-JAX reference (for correctness check) ----------------
def gru_forward_ref(states, len_states, params, hidden_size, item_num):
    B, T = states.shape
    H = hidden_size
    emb = jnp.take(params["item_emb"], states, axis=0)       # [B, T, H]
    w_ih, w_hh = params["w_ih"], params["w_hh"]
    b_ih, b_hh = params["b_ih"], params["b_hh"]

    def cell(h, inputs):
        x, valid = inputs
        gi = x @ w_ih.T + b_ih
        gh = h @ w_hh.T + b_hh
        r = jax.nn.sigmoid(gi[:, :H] + gh[:, :H])
        z = jax.nn.sigmoid(gi[:, H:2 * H] + gh[:, H:2 * H])
        n = jnp.tanh(gi[:, 2 * H:] + r * gh[:, 2 * H:])
        h_new = (1.0 - z) * n + z * h
        h = jnp.where(valid[:, None], h_new, h)
        return h, None

    xs = jnp.transpose(emb, (1, 0, 2))                        # [T, B, H]
    valid = (jnp.arange(T)[:, None] < len_states[None, :])    # [T, B]
    h0 = jnp.zeros((B, H), jnp.float32)
    hT, _ = lax.scan(cell, h0, (xs, valid))
    return hT @ params["w_fc"].T + params["b_fc"]


if __name__ == "__main__":
    # Small shapes consistent with the module.
    hidden_size = 32          # H
    item_num = 64             # number of items (output logits dim)
    state_size = 8            # T (max sequence length)
    batch = 8                 # B

    key = jax.random.PRNGKey(0)
    keys = jax.random.split(key, 8)
    bound = 1.0 / jnp.sqrt(hidden_size)

    params = {
        # nn.Embedding(item_num + 1, H), init normal(0, 0.01)
        "item_emb": 0.01 * jax.random.normal(
            keys[0], (item_num + 1, hidden_size), jnp.float32),
        # nn.GRU weights (PyTorch layout, gate order r|z|n), uniform(-1/sqrt(H), 1/sqrt(H))
        "w_ih": jax.random.uniform(keys[1], (3 * hidden_size, hidden_size),
                                   jnp.float32, -bound, bound),
        "w_hh": jax.random.uniform(keys[2], (3 * hidden_size, hidden_size),
                                   jnp.float32, -bound, bound),
        "b_ih": jax.random.uniform(keys[3], (3 * hidden_size,),
                                   jnp.float32, -bound, bound),
        "b_hh": jax.random.uniform(keys[4], (3 * hidden_size,),
                                   jnp.float32, -bound, bound),
        # nn.Linear(H, item_num)
        "w_fc": jax.random.uniform(keys[5], (item_num, hidden_size),
                                   jnp.float32, -bound, bound),
        "b_fc": jax.random.uniform(keys[6], (item_num,),
                                   jnp.float32, -bound, bound),
    }

    # Deterministic example inputs: item ids in [0, item_num], lengths in [1, T].
    states = jax.random.randint(keys[7], (batch, state_size), 0, item_num + 1,
                                dtype=jnp.int32)
    len_states = jnp.array([8, 3, 5, 1, 7, 2, 8, 4], dtype=jnp.int32)

    ref = gru_forward_ref(states, len_states, params, hidden_size, item_num)

    # f32 matmul operands: tight correctness check against the reference.
    out = gru_forward_pallas(states, len_states, params, hidden_size, item_num,
                             compute_dtype=jnp.float32)
    out = jax.block_until_ready(out)
    assert out.shape == (batch, item_num)
    assert jnp.allclose(out, ref, atol=1e-4, rtol=1e-4), "f32 kernel mismatch vs reference"

    # bf16 matmul operands (native MXU input on v6e/v7x) with f32 accumulation:
    # loose tolerance (bf16 rounding of weights/activations).
    out_bf16 = gru_forward_pallas(states, len_states, params, hidden_size, item_num,
                                  compute_dtype=jnp.bfloat16)
    out_bf16 = jax.block_until_ready(out_bf16)
    assert jnp.allclose(out_bf16, ref, atol=5e-2, rtol=5e-2), "bf16 kernel mismatch vs reference"

    print("KERNEL_OK")
</pallas_src>

<mosaic_0001>
module attributes {stable_mosaic.version = 11 : i64} {
  func.func @gru_recurrence_kernel(%arg0: i32, %arg1: i32, %arg2: memref<8x1xf32, #tpu.memory_space<vmem>>, %arg3: memref<8x8x32xf32, #tpu.memory_space<vmem>>, %arg4: memref<32x384xf32, #tpu.memory_space<vmem>>, %arg5: memref<128x384xf32, #tpu.memory_space<vmem>>, %arg6: memref<1x384xf32, #tpu.memory_space<vmem>>, %arg7: memref<1x384xf32, #tpu.memory_space<vmem>>, %arg8: memref<8x128xf32, #tpu.memory_space<vmem>>, %arg9: memref<8x8x384xf32, #tpu.memory_space<vmem>>, %arg10: memref<8x128xf32, #tpu.memory_space<vmem>>) attributes {dimension_semantics = [#tpu.dimension_semantics<parallel>, #tpu.dimension_semantics<arbitrary>], iteration_bounds = array<i64: 1, 1>, scalar_prefetch = 0 : i64, scratch_operands = 2 : i64, tpu.core_type = #tpu.core_type<tc>, window_params = [{transform_indices = @transform_0, window_bounds = array<i64: 8, 1>}, {transform_indices = @transform_1, window_bounds = array<i64: 8, 8, 32>}, {pipeline_mode = #tpu.pipeline_mode<synchronous>, transform_indices = @transform_2, window_bounds = array<i64: 32, 384>}, {pipeline_mode = #tpu.pipeline_mode<synchronous>, transform_indices = @transform_3, window_bounds = array<i64: 128, 384>}, {pipeline_mode = #tpu.pipeline_mode<synchronous>, transform_indices = @transform_4, window_bounds = array<i64: 1, 384>}, {pipeline_mode = #tpu.pipeline_mode<synchronous>, transform_indices = @transform_5, window_bounds = array<i64: 1, 384>}, {transform_indices = @transform_6, window_bounds = array<i64: 8, 128>}]} {
    %c0_i32 = arith.constant 0 : i32
    %0 = arith.cmpi eq, %arg1, %c0_i32 : i32
    %1 = arith.extui %0 : i1 to i32
    %c0_i32_0 = arith.constant 0 : i32
    %2 = arith.cmpi ne, %1, %c0_i32_0 : i32
    scf.if %2 {
      %cst_72 = arith.constant 0.000000e+00 : f32
      %349 = vector.broadcast %cst_72 : f32 to vector<8x128xf32>
      %c0_73 = arith.constant 0 : index
      %c0_74 = arith.constant 0 : index
      %350 = vector.load %arg10[%c0_73, %c0_74] : memref<8x128xf32, #tpu.memory_space<vmem>>, vector<8x128xf32>
      tpu.vector_store %arg10[%c0_73, %c0_74], %349 {strides = array<i32>} : memref<8x128xf32, #tpu.memory_space<vmem>>, vector<8x128xf32>,
    } else {
    }
    %c0 = arith.constant 0 : index
    %c0_1 = arith.constant 0 : index
    %c0_2 = arith.constant 0 : index
    %3 = vector.load %arg3[%c0, %c0_1, %c0_2] : memref<8x8x32xf32, #tpu.memory_space<vmem>>, vector<8x8x32xf32>
    %4 = vector.shape_cast %3 : vector<8x8x32xf32> to vector<64x32xf32>
    %c0_3 = arith.constant 0 : index
    %c0_4 = arith.constant 0 : index
    %5 = vector.load %arg4[%c0_3, %c0_4] : memref<32x384xf32, #tpu.memory_space<vmem>>, vector<32x384xf32>
    %cst = arith.constant dense<0.000000e+00> : vector<64x384xf32>
    %6 = tpu.matmul %4, %5, %cst {dimension_numbers = #tpu.dot_dimension_numbers<[1], [0], [0], [1], [0, 0, 1, 1], [], []>} : vector<64x32xf32>, vector<32x384xf32>, vector<64x384xf32> -> vector<64x384xf32>
    %c0_5 = arith.constant 0 : index
    %c0_6 = arith.constant 0 : index
    %7 = vector.load %arg6[%c0_5, %c0_6] : memref<1x384xf32, #tpu.memory_space<vmem>>, vector<1x384xf32>
    %8 = vector.broadcast %7 : vector<1x384xf32> to vector<64x384xf32>
    %9 = arith.addf %6, %8 : vector<64x384xf32>
    %10 = vector.shape_cast %9 : vector<64x384xf32> to vector<8x8x384xf32>
    %c0_7 = arith.constant 0 : index
    %c0_8 = arith.constant 0 : index
    %c0_9 = arith.constant 0 : index
    %11 = vector.load %arg9[%c0_7, %c0_8, %c0_9] : memref<8x8x384xf32, #tpu.memory_space<vmem>>, vector<8x8x384xf32>
    tpu.vector_store %arg9[%c0_7, %c0_8, %c0_9], %10 {strides = array<i32>} : memref<8x8x384xf32, #tpu.memory_space<vmem>>, vector<8x8x384xf32>,
    %c0_10 = arith.constant 0 : index
    %c0_11 = arith.constant 0 : index
    %12 = vector.load %arg5[%c0_10, %c0_11] : memref<128x384xf32, #tpu.memory_space<vmem>>, vector<128x384xf32>
    %c0_12 = arith.constant 0 : index
    %c0_13 = arith.constant 0 : index
    %13 = vector.load %arg7[%c0_12, %c0_13] : memref<1x384xf32, #tpu.memory_space<vmem>>, vector<1x384xf32>
    %c0_14 = arith.constant 0 : index
    %c0_15 = arith.constant 0 : index
    %14 = vector.load %arg2[%c0_14, %c0_15] : memref<8x1xf32, #tpu.memory_space<vmem>>, vector<8x1xf32>
    %c8_i32 = arith.constant 8 : i32
    %15 = arith.muli %arg1, %c8_i32 : i32
    %c0_16 = arith.constant 0 : index
    %c0_17 = arith.constant 0 : index
    %16 = vector.load %arg10[%c0_16, %c0_17] : memref<8x128xf32, #tpu.memory_space<vmem>>, vector<8x128xf32>
    %c0_18 = arith.constant 0 : index
    %c0_19 = arith.constant 0 : index
    %c0_20 = arith.constant 0 : index
    %17 = vector.load %arg9[%c0_18, %c0_19, %c0_20] : memref<8x8x384xf32, #tpu.memory_space<vmem>>, vector<1x8x384xf32>
    %18 = vector.shape_cast %17 : vector<1x8x384xf32> to vector<8x384xf32>
    %cst_21 = arith.constant dense<0.000000e+00> : vector<8x384xf32>
    %19 = tpu.matmul %16, %12, %cst_21 {dimension_numbers = #tpu.dot_dimension_numbers<[1], [0], [0], [1], [0, 0, 1, 1], [], []>} : vector<8x128xf32>, vector<128x384xf32>, vector<8x384xf32> -> vector<8x384xf32>
    %20 = vector.broadcast %13 : vector<1x384xf32> to vector<8x384xf32>
    %21 = arith.addf %19, %20 : vector<8x384xf32>
    %22 = vector.extract_strided_slice %18 {offsets = [0, 0], sizes = [8, 128], strides = [1, 1]} : vector<8x384xf32> to vector<8x128xf32>
    %23 = vector.extract_strided_slice %21 {offsets = [0, 0], sizes = [8, 128], strides = [1, 1]} : vector<8x384xf32> to vector<8x128xf32>
    %24 = arith.addf %22, %23 : vector<8x128xf32>
    %25 = arith.negf %24 : vector<8x128xf32>
    %26 = math.exp %25 : vector<8x128xf32>
    %cst_22 = arith.constant 1.000000e+00 : f32
    %27 = vector.broadcast %cst_22 : f32 to vector<8x128xf32>
    %28 = arith.addf %27, %26 : vector<8x128xf32>
    %29 = arith.divf %27, %28 : vector<8x128xf32>
    %30 = vector.extract_strided_slice %18 {offsets = [0, 128], sizes = [8, 128], strides = [1, 1]} : vector<8x384xf32> to vector<8x128xf32>
    %31 = vector.extract_strided_slice %21 {offsets = [0, 128], sizes = [8, 128], strides = [1, 1]} : vector<8x384xf32> to vector<8x128xf32>
    %32 = arith.addf %30, %31 : vector<8x128xf32>
    %33 = arith.negf %32 : vector<8x128xf32>
    %34 = math.exp %33 : vector<8x128xf32>
    %cst_23 = arith.constant 1.000000e+00 : f32
    %35 = vector.broadcast %cst_23 : f32 to vector<8x128xf32>
    %36 = arith.addf %35, %34 : vector<8x128xf32>
    %37 = arith.divf %35, %36 : vector<8x128xf32>
    %38 = vector.extract_strided_slice %18 {offsets = [0, 256], sizes = [8, 128], strides = [1, 1]} : vector<8x384xf32> to vector<8x128xf32>
    %39 = vector.extract_strided_slice %21 {offsets = [0, 256], sizes = [8, 128], strides = [1, 1]} : vector<8x384xf32> to vector<8x128xf32>
    %40 = arith.mulf %29, %39 : vector<8x128xf32>
    %41 = arith.addf %38, %40 : vector<8x128xf32>
    %42 = math.tanh %41 : vector<8x128xf32>
    %cst_24 = arith.constant 1.000000e+00 : f32
    %43 = vector.broadcast %cst_24 : f32 to vector<8x128xf32>
    %44 = arith.subf %43, %37 : vector<8x128xf32>
    %45 = arith.mulf %44, %42 : vector<8x128xf32>
    %46 = arith.mulf %37, %16 : vector<8x128xf32>
    %47 = arith.addf %45, %46 : vector<8x128xf32>
    %c0_i32_25 = arith.constant 0 : i32
    %48 = arith.addi %15, %c0_i32_25 : i32
    %49 = arith.sitofp %48 : i32 to f32
    %50 = vector.broadcast %49 : f32 to vector<8x1xf32>
    %51 = arith.cmpf ogt, %14, %50 : vector<8x1xf32>
    %52 = arith.extui %51 : vector<8x1xi1> to vector<8x1xi32>
    %53 = arith.sitofp %52 : vector<8x1xi32> to vector<8x1xf32>
    %54 = arith.subf %47, %16 : vector<8x128xf32>
    %55 = vector.broadcast %53 : vector<8x1xf32> to vector<8x128xf32>
    %56 = arith.mulf %55, %54 : vector<8x128xf32>
    %57 = arith.addf %16, %56 : vector<8x128xf32>
    %c1 = arith.constant 1 : index
    %c0_26 = arith.constant 0 : index
    %c0_27 = arith.constant 0 : index
    %58 = vector.load %arg9[%c1, %c0_26, %c0_27] : memref<8x8x384xf32, #tpu.memory_space<vmem>>, vector<1x8x384xf32>
    %59 = vector.shape_cast %58 : vector<1x8x384xf32> to vector<8x384xf32>
    %cst_28 = arith.constant dense<0.000000e+00> : vector<8x384xf32>
    %60 = tpu.matmul %57, %12, %cst_28 {dimension_numbers = #tpu.dot_dimension_numbers<[1], [0], [0], [1], [0, 0, 1, 1], [], []>} : vector<8x128xf32>, vector<128x384xf32>, vector<8x384xf32> -> vector<8x384xf32>
    %61 = vector.broadcast %13 : vector<1x384xf32> to vector<8x384xf32>
    %62 = arith.addf %60, %61 : vector<8x384xf32>
    %63 = vector.extract_strided_slice %59 {offsets = [0, 0], sizes = [8, 128], strides = [1, 1]} : vector<8x384xf32> to vector<8x128xf32>
    %64 = vector.extract_strided_slice %62 {offsets = [0, 0], sizes = [8, 128], strides = [1, 1]} : vector<8x384xf32> to vector<8x128xf32>
    %65 = arith.addf %63, %64 : vector<8x128xf32>
    %66 = arith.negf %65 : vector<8x128xf32>
    %67 = math.exp %66 : vector<8x128xf32>
    %cst_29 = arith.constant 1.000000e+00 : f32
    %68 = vector.broadcast %cst_29 : f32 to vector<8x128xf32>
    %69 = arith.addf %68, %67 : vector<8x128xf32>
    %70 = arith.divf %68, %69 : vector<8x128xf32>
    %71 = vector.extract_strided_slice %59 {offsets = [0, 128], sizes = [8, 128], strides = [1, 1]} : vector<8x384xf32> to vector<8x128xf32>
    %72 = vector.extract_strided_slice %62 {offsets = [0, 128], sizes = [8, 128], strides = [1, 1]} : vector<8x384xf32> to vector<8x128xf32>
    %73 = arith.addf %71, %72 : vector<8x128xf32>
    %74 = arith.negf %73 : vector<8x128xf32>
    %75 = math.exp %74 : vector<8x128xf32>
    %cst_30 = arith.constant 1.000000e+00 : f32
    %76 = vector.broadcast %cst_30 : f32 to vector<8x128xf32>
    %77 = arith.addf %76, %75 : vector<8x128xf32>
    %78 = arith.divf %76, %77 : vector<8x128xf32>
    %79 = vector.extract_strided_slice %59 {offsets = [0, 256], sizes = [8, 128], strides = [1, 1]} : vector<8x384xf32> to vector<8x128xf32>
    %80 = vector.extract_strided_slice %62 {offsets = [0, 256], sizes = [8, 128], strides = [1, 1]} : vector<8x384xf32> to vector<8x128xf32>
    %81 = arith.mulf %70, %80 : vector<8x128xf32>
    %82 = arith.addf %79, %81 : vector<8x128xf32>
    %83 = math.tanh %82 : vector<8x128xf32>
    %cst_31 = arith.constant 1.000000e+00 : f32
    %84 = vector.broadcast %cst_31 : f32 to vector<8x128xf32>
    %85 = arith.subf %84, %78 : vector<8x128xf32>
    %86 = arith.mulf %85, %83 : vector<8x128xf32>
    %87 = arith.mulf %78, %57 : vector<8x128xf32>
    %88 = arith.addf %86, %87 : vector<8x128xf32>
    %c1_i32 = arith.constant 1 : i32
    %89 = arith.addi %15, %c1_i32 : i32
    %90 = arith.sitofp %89 : i32 to f32
    %91 = vector.broadcast %90 : f32 to vector<8x1xf32>
    %92 = arith.cmpf ogt, %14, %91 : vector<8x1xf32>
    %93 = arith.extui %92 : vector<8x1xi1> to vector<8x1xi32>
    %94 = arith.sitofp %93 : vector<8x1xi32> to vector<8x1xf32>
    %95 = arith.subf %88, %57 : vector<8x128xf32>
    %96 = vector.broadcast %94 : vector<8x1xf32> to vector<8x128xf32>
    %97 = arith.mulf %96, %95 : vector<8x128xf32>
    %98 = arith.addf %57, %97 : vector<8x128xf32>
    %c2 = arith.constant 2 : index
    %c0_32 = arith.constant 0 : index
    %c0_33 = arith.constant 0 : index
    %99 = vector.load %arg9[%c2, %c0_32, %c0_33] : memref<8x8x384xf32, #tpu.memory_space<vmem>>, vector<1x8x384xf32>
    %100 = vector.shape_cast %99 : vector<1x8x384xf32> to vector<8x384xf32>
    %cst_34 = arith.constant dense<0.000000e+00> : vector<8x384xf32>
    %101 = tpu.matmul %98, %12, %cst_34 {dimension_numbers = #tpu.dot_dimension_numbers<[1], [0], [0], [1], [0, 0, 1, 1], [], []>} : vector<8x128xf32>, vector<128x384xf32>, vector<8x384xf32> -> vector<8x384xf32>
    %102 = vector.broadcast %13 : vector<1x384xf32> to vector<8x384xf32>
    %103 = arith.addf %101, %102 : vector<8x384xf32>
    %104 = vector.extract_strided_slice %100 {offsets = [0, 0], sizes = [8, 128], strides = [1, 1]} : vector<8x384xf32> to vector<8x128xf32>
    %105 = vector.extract_strided_slice %103 {offsets = [0, 0], sizes = [8, 128], strides = [1, 1]} : vector<8x384xf32> to vector<8x128xf32>
    %106 = arith.addf %104, %105 : vector<8x128xf32>
    %107 = arith.negf %106 : vector<8x128xf32>
    %108 = math.exp %107 : vector<8x128xf32>
    %cst_35 = arith.constant 1.000000e+00 : f32
    %109 = vector.broadcast %cst_35 : f32 to vector<8x128xf32>
    %110 = arith.addf %109, %108 : vector<8x128xf32>
    %111 = arith.divf %109, %110 : vector<8x128xf32>
    %112 = vector.extract_strided_slice %100 {offsets = [0, 128], sizes = [8, 128], strides = [1, 1]} : vector<8x384xf32> to vector<8x128xf32>
    %113 = vector.extract_strided_slice %103 {offsets = [0, 128], sizes = [8, 128], strides = [1, 1]} : vector<8x384xf32> to vector<8x128xf32>
    %114 = arith.addf %112, %113 : vector<8x128xf32>
    %115 = arith.negf %114 : vector<8x128xf32>
    %116 = math.exp %115 : vector<8x128xf32>
    %cst_36 = arith.constant 1.000000e+00 : f32
    %117 = vector.broadcast %cst_36 : f32 to vector<8x128xf32>
    %118 = arith.addf %117, %116 : vector<8x128xf32>
    %119 = arith.divf %117, %118 : vector<8x128xf32>
    %120 = vector.extract_strided_slice %100 {offsets = [0, 256], sizes = [8, 128], strides = [1, 1]} : vector<8x384xf32> to vector<8x128xf32>
    %121 = vector.extract_strided_slice %103 {offsets = [0, 256], sizes = [8, 128], strides = [1, 1]} : vector<8x384xf32> to vector<8x128xf32>
    %122 = arith.mulf %111, %121 : vector<8x128xf32>
    %123 = arith.addf %120, %122 : vector<8x128xf32>
    %124 = math.tanh %123 : vector<8x128xf32>
    %cst_37 = arith.constant 1.000000e+00 : f32
    %125 = vector.broadcast %cst_37 : f32 to vector<8x128xf32>
    %126 = arith.subf %125, %119 : vector<8x128xf32>
    %127 = arith.mulf %126, %124 : vector<8x128xf32>
    %128 = arith.mulf %119, %98 : vector<8x128xf32>
    %129 = arith.addf %127, %128 : vector<8x128xf32>
    %c2_i32 = arith.constant 2 : i32
    %130 = arith.addi %15, %c2_i32 : i32
    %131 = arith.sitofp %130 : i32 to f32
    %132 = vector.broadcast %131 : f32 to vector<8x1xf32>
    %133 = arith.cmpf ogt, %14, %132 : vector<8x1xf32>
    %134 = arith.extui %133 : vector<8x1xi1> to vector<8x1xi32>
    %135 = arith.sitofp %134 : vector<8x1xi32> to vector<8x1xf32>
    %136 = arith.subf %129, %98 : vector<8x128xf32>
    %137 = vector.broadcast %135 : vector<8x1xf32> to vector<8x128xf32>
    %138 = arith.mulf %137, %136 : vector<8x128xf32>
    %139 = arith.addf %98, %138 : vector<8x128xf32>
    %c3 = arith.constant 3 : index
    %c0_38 = arith.constant 0 : index
    %c0_39 = arith.constant 0 : index
    %140 = vector.load %arg9[%c3, %c0_38, %c0_39] : memref<8x8x384xf32, #tpu.memory_space<vmem>>, vector<1x8x384xf32>
    %141 = vector.shape_cast %140 : vector<1x8x384xf32> to vector<8x384xf32>
    %cst_40 = arith.constant dense<0.000000e+00> : vector<8x384xf32>
    %142 = tpu.matmul %139, %12, %cst_40 {dimension_numbers = #tpu.dot_dimension_numbers<[1], [0], [0], [1], [0, 0, 1, 1], [], []>} : vector<8x128xf32>, vector<128x384xf32>, vector<8x384xf32> -> vector<8x384xf32>
    %143 = vector.broadcast %13 : vector<1x384xf32> to vector<8x384xf32>
    %144 = arith.addf %142, %143 : vector<8x384xf32>
    %145 = vector.extract_strided_slice %141 {offsets = [0, 0], sizes = [8, 128], strides = [1, 1]} : vector<8x384xf32> to vector<8x128xf32>
    %146 = vector.extract_strided_slice %144 {offsets = [0, 0], sizes = [8, 128], strides = [1, 1]} : vector<8x384xf32> to vector<8x128xf32>
    %147 = arith.addf %145, %146 : vector<8x128xf32>
    %148 = arith.negf %147 : vector<8x128xf32>
    %149 = math.exp %148 : vector<8x128xf32>
    %cst_41 = arith.constant 1.000000e+00 : f32
    %150 = vector.broadcast %cst_41 : f32 to vector<8x128xf32>
    %151 = arith.addf %150, %149 : vector<8x128xf32>
    %152 = arith.divf %150, %151 : vector<8x128xf32>
    %153 = vector.extract_strided_slice %141 {offsets = [0, 128], sizes = [8, 128], strides = [1, 1]} : vector<8x384xf32> to vector<8x128xf32>
    %154 = vector.extract_strided_slice %144 {offsets = [0, 128], sizes = [8, 128], strides = [1, 1]} : vector<8x384xf32> to vector<8x128xf32>
    %155 = arith.addf %153, %154 : vector<8x128xf32>
    %156 = arith.negf %155 : vector<8x128xf32>
    %157 = math.exp %156 : vector<8x128xf32>
    %cst_42 = arith.constant 1.000000e+00 : f32
    %158 = vector.broadcast %cst_42 : f32 to vector<8x128xf32>
    %159 = arith.addf %158, %157 : vector<8x128xf32>
    %160 = arith.divf %158, %159 : vector<8x128xf32>
    %161 = vector.extract_strided_slice %141 {offsets = [0, 256], sizes = [8, 128], strides = [1, 1]} : vector<8x384xf32> to vector<8x128xf32>
    %162 = vector.extract_strided_slice %144 {offsets = [0, 256], sizes = [8, 128], strides = [1, 1]} : vector<8x384xf32> to vector<8x128xf32>
    %163 = arith.mulf %152, %162 : vector<8x128xf32>
    %164 = arith.addf %161, %163 : vector<8x128xf32>
    %165 = math.tanh %164 : vector<8x128xf32>
    %cst_43 = arith.constant 1.000000e+00 : f32
    %166 = vector.broadcast %cst_43 : f32 to vector<8x128xf32>
    %167 = arith.subf %166, %160 : vector<8x128xf32>
    %168 = arith.mulf %167, %165 : vector<8x128xf32>
    %169 = arith.mulf %160, %139 : vector<8x128xf32>
    %170 = arith.addf %168, %169 : vector<8x128xf32>
    %c3_i32 = arith.constant 3 : i32
    %171 = arith.addi %15, %c3_i32 : i32
    %172 = arith.sitofp %171 : i32 to f32
    %173 = vector.broadcast %172 : f32 to vector<8x1xf32>
    %174 = arith.cmpf ogt, %14, %173 : vector<8x1xf32>
    %175 = arith.extui %174 : vector<8x1xi1> to vector<8x1xi32>
    %176 = arith.sitofp %175 : vector<8x1xi32> to vector<8x1xf32>
    %177 = arith.subf %170, %139 : vector<8x128xf32>
    %178 = vector.broadcast %176 : vector<8x1xf32> to vector<8x128xf32>
    %179 = arith.mulf %178, %177 : vector<8x128xf32>
    %180 = arith.addf %139, %179 : vector<8x128xf32>
    %c4 = arith.constant 4 : index
    %c0_44 = arith.constant 0 : index
    %c0_45 = arith.constant 0 : index
    %181 = vector.load %arg9[%c4, %c0_44, %c0_45] : memref<8x8x384xf32, #tpu.memory_space<vmem>>, vector<1x8x384xf32>
    %182 = vector.shape_cast %181 : vector<1x8x384xf32> to vector<8x384xf32>
    %cst_46 = arith.constant dense<0.000000e+00> : vector<8x384xf32>
    %183 = tpu.matmul %180, %12, %cst_46 {dimension_numbers = #tpu.dot_dimension_numbers<[1], [0], [0], [1], [0, 0, 1, 1], [], []>} : vector<8x128xf32>, vector<128x384xf32>, vector<8x384xf32> -> vector<8x384xf32>
    %184 = vector.broadcast %13 : vector<1x384xf32> to vector<8x384xf32>
    %185 = arith.addf %183, %184 : vector<8x384xf32>
    %186 = vector.extract_strided_slice %182 {offsets = [0, 0], sizes = [8, 128], strides = [1, 1]} : vector<8x384xf32> to vector<8x128xf32>
    %187 = vector.extract_strided_slice %185 {offsets = [0, 0], sizes = [8, 128], strides = [1, 1]} : vector<8x384xf32> to vector<8x128xf32>
    %188 = arith.addf %186, %187 : vector<8x128xf32>
    %189 = arith.negf %188 : vector<8x128xf32>
    %190 = math.exp %189 : vector<8x128xf32>
    %cst_47 = arith.constant 1.000000e+00 : f32
    %191 = vector.broadcast %cst_47 : f32 to vector<8x128xf32>
    %192 = arith.addf %191, %190 : vector<8x128xf32>
    %193 = arith.divf %191, %192 : vector<8x128xf32>
    %194 = vector.extract_strided_slice %182 {offsets = [0, 128], sizes = [8, 128], strides = [1, 1]} : vector<8x384xf32> to vector<8x128xf32>
    %195 = vector.extract_strided_slice %185 {offsets = [0, 128], sizes = [8, 128], strides = [1, 1]} : vector<8x384xf32> to vector<8x128xf32>
    %196 = arith.addf %194, %195 : vector<8x128xf32>
    %197 = arith.negf %196 : vector<8x128xf32>
    %198 = math.exp %197 : vector<8x128xf32>
    %cst_48 = arith.constant 1.000000e+00 : f32
    %199 = vector.broadcast %cst_48 : f32 to vector<8x128xf32>
    %200 = arith.addf %199, %198 : vector<8x128xf32>
    %201 = arith.divf %199, %200 : vector<8x128xf32>
    %202 = vector.extract_strided_slice %182 {offsets = [0, 256], sizes = [8, 128], strides = [1, 1]} : vector<8x384xf32> to vector<8x128xf32>
    %203 = vector.extract_strided_slice %185 {offsets = [0, 256], sizes = [8, 128], strides = [1, 1]} : vector<8x384xf32> to vector<8x128xf32>
    %204 = arith.mulf %193, %203 : vector<8x128xf32>
    %205 = arith.addf %202, %204 : vector<8x128xf32>
    %206 = math.tanh %205 : vector<8x128xf32>
    %cst_49 = arith.constant 1.000000e+00 : f32
    %207 = vector.broadcast %cst_49 : f32 to vector<8x128xf32>
    %208 = arith.subf %207, %201 : vector<8x128xf32>
    %209 = arith.mulf %208, %206 : vector<8x128xf32>
    %210 = arith.mulf %201, %180 : vector<8x128xf32>
    %211 = arith.addf %209, %210 : vector<8x128xf32>
    %c4_i32 = arith.constant 4 : i32
    %212 = arith.addi %15, %c4_i32 : i32
    %213 = arith.sitofp %212 : i32 to f32
    %214 = vector.broadcast %213 : f32 to vector<8x1xf32>
    %215 = arith.cmpf ogt, %14, %214 : vector<8x1xf32>
    %216 = arith.extui %215 : vector<8x1xi1> to vector<8x1xi32>
    %217 = arith.sitofp %216 : vector<8x1xi32> to vector<8x1xf32>
    %218 = arith.subf %211, %180 : vector<8x128xf32>
    %219 = vector.broadcast %217 : vector<8x1xf32> to vector<8x128xf32>
    %220 = arith.mulf %219, %218 : vector<8x128xf32>
    %221 = arith.addf %180, %220 : vector<8x128xf32>
    %c5 = arith.constant 5 : index
    %c0_50 = arith.constant 0 : index
    %c0_51 = arith.constant 0 : index
    %222 = vector.load %arg9[%c5, %c0_50, %c0_51] : memref<8x8x384xf32, #tpu.memory_space<vmem>>, vector<1x8x384xf32>
    %223 = vector.shape_cast %222 : vector<1x8x384xf32> to vector<8x384xf32>
    %cst_52 = arith.constant dense<0.000000e+00> : vector<8x384xf32>
    %224 = tpu.matmul %221, %12, %cst_52 {dimension_numbers = #tpu.dot_dimension_numbers<[1], [0], [0], [1], [0, 0, 1, 1], [], []>} : vector<8x128xf32>, vector<128x384xf32>, vector<8x384xf32> -> vector<8x384xf32>
    %225 = vector.broadcast %13 : vector<1x384xf32> to vector<8x384xf32>
    %226 = arith.addf %224, %225 : vector<8x384xf32>
    %227 = vector.extract_strided_slice %223 {offsets = [0, 0], sizes = [8, 128], strides = [1, 1]} : vector<8x384xf32> to vector<8x128xf32>
    %228 = vector.extract_strided_slice %226 {offsets = [0, 0], sizes = [8, 128], strides = [1, 1]} : vector<8x384xf32> to vector<8x128xf32>
    %229 = arith.addf %227, %228 : vector<8x128xf32>
    %230 = arith.negf %229 : vector<8x128xf32>
    %231 = math.exp %230 : vector<8x128xf32>
    %cst_53 = arith.constant 1.000000e+00 : f32
    %232 = vector.broadcast %cst_53 : f32 to vector<8x128xf32>
    %233 = arith.addf %232, %231 : vector<8x128xf32>
    %234 = arith.divf %232, %233 : vector<8x128xf32>
    %235 = vector.extract_strided_slice %223 {offsets = [0, 128], sizes = [8, 128], strides = [1, 1]} : vector<8x384xf32> to vector<8x128xf32>
    %236 = vector.extract_strided_slice %226 {offsets = [0, 128], sizes = [8, 128], strides = [1, 1]} : vector<8x384xf32> to vector<8x128xf32>
    %237 = arith.addf %235, %236 : vector<8x128xf32>
    %238 = arith.negf %237 : vector<8x128xf32>
    %239 = math.exp %238 : vector<8x128xf32>
    %cst_54 = arith.constant 1.000000e+00 : f32
    %240 = vector.broadcast %cst_54 : f32 to vector<8x128xf32>
    %241 = arith.addf %240, %239 : vector<8x128xf32>
    %242 = arith.divf %240, %241 : vector<8x128xf32>
    %243 = vector.extract_strided_slice %223 {offsets = [0, 256], sizes = [8, 128], strides = [1, 1]} : vector<8x384xf32> to vector<8x128xf32>
    %244 = vector.extract_strided_slice %226 {offsets = [0, 256], sizes = [8, 128], strides = [1, 1]} : vector<8x384xf32> to vector<8x128xf32>
    %245 = arith.mulf %234, %244 : vector<8x128xf32>
    %246 = arith.addf %243, %245 : vector<8x128xf32>
    %247 = math.tanh %246 : vector<8x128xf32>
    %cst_55 = arith.constant 1.000000e+00 : f32
    %248 = vector.broadcast %cst_55 : f32 to vector<8x128xf32>
    %249 = arith.subf %248, %242 : vector<8x128xf32>
    %250 = arith.mulf %249, %247 : vector<8x128xf32>
    %251 = arith.mulf %242, %221 : vector<8x128xf32>
    %252 = arith.addf %250, %251 : vector<8x128xf32>
    %c5_i32 = arith.constant 5 : i32
    %253 = arith.addi %15, %c5_i32 : i32
    %254 = arith.sitofp %253 : i32 to f32
    %255 = vector.broadcast %254 : f32 to vector<8x1xf32>
    %256 = arith.cmpf ogt, %14, %255 : vector<8x1xf32>
    %257 = arith.extui %256 : vector<8x1xi1> to vector<8x1xi32>
    %258 = arith.sitofp %257 : vector<8x1xi32> to vector<8x1xf32>
    %259 = arith.subf %252, %221 : vector<8x128xf32>
    %260 = vector.broadcast %258 : vector<8x1xf32> to vector<8x128xf32>
    %261 = arith.mulf %260, %259 : vector<8x128xf32>
    %262 = arith.addf %221, %261 : vector<8x128xf32>
    %c6 = arith.constant 6 : index
    %c0_56 = arith.constant 0 : index
    %c0_57 = arith.constant 0 : index
    %263 = vector.load %arg9[%c6, %c0_56, %c0_57] : memref<8x8x384xf32, #tpu.memory_space<vmem>>, vector<1x8x384xf32>
    %264 = vector.shape_cast %263 : vector<1x8x384xf32> to vector<8x384xf32>
    %cst_58 = arith.constant dense<0.000000e+00> : vector<8x384xf32>
    %265 = tpu.matmul %262, %12, %cst_58 {dimension_numbers = #tpu.dot_dimension_numbers<[1], [0], [0], [1], [0, 0, 1, 1], [], []>} : vector<8x128xf32>, vector<128x384xf32>, vector<8x384xf32> -> vector<8x384xf32>
    %266 = vector.broadcast %13 : vector<1x384xf32> to vector<8x384xf32>
    %267 = arith.addf %265, %266 : vector<8x384xf32>
    %268 = vector.extract_strided_slice %264 {offsets = [0, 0], sizes = [8, 128], strides = [1, 1]} : vector<8x384xf32> to vector<8x128xf32>
    %269 = vector.extract_strided_slice %267 {offsets = [0, 0], sizes = [8, 128], strides = [1, 1]} : vector<8x384xf32> to vector<8x128xf32>
    %270 = arith.addf %268, %269 : vector<8x128xf32>
    %271 = arith.negf %270 : vector<8x128xf32>
    %272 = math.exp %271 : vector<8x128xf32>
    %cst_59 = arith.constant 1.000000e+00 : f32
    %273 = vector.broadcast %cst_59 : f32 to vector<8x128xf32>
    %274 = arith.addf %273, %272 : vector<8x128xf32>
    %275 = arith.divf %273, %274 : vector<8x128xf32>
    %276 = vector.extract_strided_slice %264 {offsets = [0, 128], sizes = [8, 128], strides = [1, 1]} : vector<8x384xf32> to vector<8x128xf32>
    %277 = vector.extract_strided_slice %267 {offsets = [0, 128], sizes = [8, 128], strides = [1, 1]} : vector<8x384xf32> to vector<8x128xf32>
    %278 = arith.addf %276, %277 : vector<8x128xf32>
    %279 = arith.negf %278 : vector<8x128xf32>
    %280 = math.exp %279 : vector<8x128xf32>
    %cst_60 = arith.constant 1.000000e+00 : f32
    %281 = vector.broadcast %cst_60 : f32 to vector<8x128xf32>
    %282 = arith.addf %281, %280 : vector<8x128xf32>
    %283 = arith.divf %281, %282 : vector<8x128xf32>
    %284 = vector.extract_strided_slice %264 {offsets = [0, 256], sizes = [8, 128], strides = [1, 1]} : vector<8x384xf32> to vector<8x128xf32>
    %285 = vector.extract_strided_slice %267 {offsets = [0, 256], sizes = [8, 128], strides = [1, 1]} : vector<8x384xf32> to vector<8x128xf32>
    %286 = arith.mulf %275, %285 : vector<8x128xf32>
    %287 = arith.addf %284, %286 : vector<8x128xf32>
    %288 = math.tanh %287 : vector<8x128xf32>
    %cst_61 = arith.constant 1.000000e+00 : f32
    %289 = vector.broadcast %cst_61 : f32 to vector<8x128xf32>
    %290 = arith.subf %289, %283 : vector<8x128xf32>
    %291 = arith.mulf %290, %288 : vector<8x128xf32>
    %292 = arith.mulf %283, %262 : vector<8x128xf32>
    %293 = arith.addf %291, %292 : vector<8x128xf32>
    %c6_i32 = arith.constant 6 : i32
    %294 = arith.addi %15, %c6_i32 : i32
    %295 = arith.sitofp %294 : i32 to f32
    %296 = vector.broadcast %295 : f32 to vector<8x1xf32>
    %297 = arith.cmpf ogt, %14, %296 : vector<8x1xf32>
    %298 = arith.extui %297 : vector<8x1xi1> to vector<8x1xi32>
    %299 = arith.sitofp %298 : vector<8x1xi32> to vector<8x1xf32>
    %300 = arith.subf %293, %262 : vector<8x128xf32>
    %301 = vector.broadcast %299 : vector<8x1xf32> to vector<8x128xf32>
    %302 = arith.mulf %301, %300 : vector<8x128xf32>
    %303 = arith.addf %262, %302 : vector<8x128xf32>
    %c7 = arith.constant 7 : index
    %c0_62 = arith.constant 0 : index
    %c0_63 = arith.constant 0 : index
    %304 = vector.load %arg9[%c7, %c0_62, %c0_63] : memref<8x8x384xf32, #tpu.memory_space<vmem>>, vector<1x8x384xf32>
    %305 = vector.shape_cast %304 : vector<1x8x384xf32> to vector<8x384xf32>
    %cst_64 = arith.constant dense<0.000000e+00> : vector<8x384xf32>
    %306 = tpu.matmul %303, %12, %cst_64 {dimension_numbers = #tpu.dot_dimension_numbers<[1], [0], [0], [1], [0, 0, 1, 1], [], []>} : vector<8x128xf32>, vector<128x384xf32>, vector<8x384xf32> -> vector<8x384xf32>
    %307 = vector.broadcast %13 : vector<1x384xf32> to vector<8x384xf32>
    %308 = arith.addf %306, %307 : vector<8x384xf32>
    %309 = vector.extract_strided_slice %305 {offsets = [0, 0], sizes = [8, 128], strides = [1, 1]} : vector<8x384xf32> to vector<8x128xf32>
    %310 = vector.extract_strided_slice %308 {offsets = [0, 0], sizes = [8, 128], strides = [1, 1]} : vector<8x384xf32> to vector<8x128xf32>
    %311 = arith.addf %309, %310 : vector<8x128xf32>
    %312 = arith.negf %311 : vector<8x128xf32>
    %313 = math.exp %312 : vector<8x128xf32>
    %cst_65 = arith.constant 1.000000e+00 : f32
    %314 = vector.broadcast %cst_65 : f32 to vector<8x128xf32>
    %315 = arith.addf %314, %313 : vector<8x128xf32>
    %316 = arith.divf %314, %315 : vector<8x128xf32>
    %317 = vector.extract_strided_slice %305 {offsets = [0, 128], sizes = [8, 128], strides = [1, 1]} : vector<8x384xf32> to vector<8x128xf32>
    %318 = vector.extract_strided_slice %308 {offsets = [0, 128], sizes = [8, 128], strides = [1, 1]} : vector<8x384xf32> to vector<8x128xf32>
    %319 = arith.addf %317, %318 : vector<8x128xf32>
    %320 = arith.negf %319 : vector<8x128xf32>
    %321 = math.exp %320 : vector<8x128xf32>
    %cst_66 = arith.constant 1.000000e+00 : f32
    %322 = vector.broadcast %cst_66 : f32 to vector<8x128xf32>
    %323 = arith.addf %322, %321 : vector<8x128xf32>
    %324 = arith.divf %322, %323 : vector<8x128xf32>
    %325 = vector.extract_strided_slice %305 {offsets = [0, 256], sizes = [8, 128], strides = [1, 1]} : vector<8x384xf32> to vector<8x128xf32>
    %326 = vector.extract_strided_slice %308 {offsets = [0, 256], sizes = [8, 128], strides = [1, 1]} : vector<8x384xf32> to vector<8x128xf32>
    %327 = arith.mulf %316, %326 : vector<8x128xf32>
    %328 = arith.addf %325, %327 : vector<8x128xf32>
    %329 = math.tanh %328 : vector<8x128xf32>
    %cst_67 = arith.constant 1.000000e+00 : f32
    %330 = vector.broadcast %cst_67 : f32 to vector<8x128xf32>
    %331 = arith.subf %330, %324 : vector<8x128xf32>
    %332 = arith.mulf %331, %329 : vector<8x128xf32>
    %333 = arith.mulf %324, %303 : vector<8x128xf32>
    %334 = arith.addf %332, %333 : vector<8x128xf32>
    %c7_i32 = arith.constant 7 : i32
    %335 = arith.addi %15, %c7_i32 : i32
    %336 = arith.sitofp %335 : i32 to f32
    %337 = vector.broadcast %336 : f32 to vector<8x1xf32>
    %338 = arith.cmpf ogt, %14, %337 : vector<8x1xf32>
    %339 = arith.extui %338 : vector<8x1xi1> to vector<8x1xi32>
    %340 = arith.sitofp %339 : vector<8x1xi32> to vector<8x1xf32>
    %341 = arith.subf %334, %303 : vector<8x128xf32>
    %342 = vector.broadcast %340 : vector<8x1xf32> to vector<8x128xf32>
    %343 = arith.mulf %342, %341 : vector<8x128xf32>
    %344 = arith.addf %303, %343 : vector<8x128xf32>
    %c0_68 = arith.constant 0 : index
    %c0_69 = arith.constant 0 : index
    %345 = vector.load %arg10[%c0_68, %c0_69] : memref<8x128xf32, #tpu.memory_space<vmem>>, vector<8x128xf32>
    tpu.vector_store %arg10[%c0_68, %c0_69], %344 {strides = array<i32>} : memref<8x128xf32, #tpu.memory_space<vmem>>, vector<8x128xf32>,
    %c0_i32_70 = arith.constant 0 : i32
    %346 = arith.cmpi eq, %arg1, %c0_i32_70 : i32
    %347 = arith.extui %346 : i1 to i32
    %c0_i32_71 = arith.constant 0 : i32
    %348 = arith.cmpi ne, %347, %c0_i32_71 : i32
    scf.if %348 {
      %c0_72 = arith.constant 0 : index
      %c0_73 = arith.constant 0 : index
      %349 = vector.load %arg8[%c0_72, %c0_73] : memref<8x128xf32, #tpu.memory_space<vmem>>, vector<8x128xf32>
      tpu.vector_store %arg8[%c0_72, %c0_73], %344 {strides = array<i32>} : memref<8x128xf32, #tpu.memory_space<vmem>>, vector<8x128xf32>,
    } else {
    }
    return
  }
  func.func @transform_0(%arg0: i32, %arg1: i32) -> (i32, i32) {
    %c0_i32 = arith.constant 0 : i32
    %c0_i32_0 = arith.constant 0 : i32
    return %arg0, %c0_i32 : i32, i32
  }
  func.func @transform_1(%arg0: i32, %arg1: i32) -> (i32, i32, i32) {
    %c0_i32 = arith.constant 0 : i32
    %c0_i32_0 = arith.constant 0 : i32
    return %arg1, %arg0, %c0_i32 : i32, i32, i32
  }
  func.func @transform_2(%arg0: i32, %arg1: i32) -> (i32, i32) {
    %c0_i32 = arith.constant 0 : i32
    %c0_i32_0 = arith.constant 0 : i32
    %c0_i32_1 = arith.constant 0 : i32
    return %c0_i32, %c0_i32_0 : i32, i32
  }
  func.func @transform_3(%arg0: i32, %arg1: i32) -> (i32, i32) {
    %c0_i32 = arith.constant 0 : i32
    %c0_i32_0 = arith.constant 0 : i32
    %c0_i32_1 = arith.constant 0 : i32
    return %c0_i32, %c0_i32_0 : i32, i32
  }
  func.func @transform_4(%arg0: i32, %arg1: i32) -> (i32, i32) {
    %c0_i32 = arith.constant 0 : i32
    %c0_i32_0 = arith.constant 0 : i32
    %c0_i32_1 = arith.constant 0 : i32
    return %c0_i32, %c0_i32_0 : i32, i32
  }
  func.func @transform_5(%arg0: i32, %arg1: i32) -> (i32, i32) {
    %c0_i32 = arith.constant 0 : i32
    %c0_i32_0 = arith.constant 0 : i32
    %c0_i32_1 = arith.constant 0 : i32
    return %c0_i32, %c0_i32_0 : i32, i32
  }
  func.func @transform_6(%arg0: i32, %arg1: i32) -> (i32, i32) {
    %c0_i32 = arith.constant 0 : i32
    %c0_i32_0 = arith.constant 0 : i32
    return %arg0, %c0_i32 : i32, i32
  }
}

</mosaic_0001>

<bundles_post_ra>
// kernel: tpu_custom_call.1
= control target key start
LH: loop header
LB: loop body
LE: loop exit
PB: predicated region body
PF: predicated region fallthrough
CT: control target
= control target key end

     0   :  { %11 = vsyncpa [#allocation5], 0  ;;  %s2535_s0 = inlined_call_operand.vmem [shape: f32[8,1], index: 0, kind: input, shape index: {}]   ;;  %s2536_s1 = inlined_call_operand.hbm [shape: f32[8,8,32], index: 1, kind: input, shape index: {}]   ;;  %s2537_s2 = inlined_call_operand.hbm [shape: f32[32,384], index: 2, kind: input, shape index: {}]   ;;  %s2538_s3 = inlined_call_operand.hbm [shape: f32[128,384], index: 3, kind: input, shape index: {}]   ;;  %s2539_s4 = inlined_call_operand.vmem [shape: f32[1,384], index: 4, kind: input, shape index: {}]   ;;  %s2540_s5 = inlined_call_operand.vmem [shape: f32[1,384], index: 5, kind: input, shape index: {}]   ;;  %s2541_s6 = inlined_call_operand.hbm [shape: f32[8,128], index: 6, kind: output, shape index: {}]  }
   0x1   :  { %12 = vsyncpa [#allocation8], 0  ;;  %s33_s23 = sshll.u32 %s2537_s2, 4  ;;  %s34_s23 = int_to_ptr.hbm [resolvable:$true] %s33_s23 }
   0x2   :  { %13 = vsyncpa [#allocation6], 0  ;;  %s1656_s24 = smov [#allocation7]   ;;  %s20_s28 = sshll.u32 %s2536_s1, 4  ;;  %s21_s28 = int_to_ptr.hbm [resolvable:$true] %s20_s28 }
   0x3   :  { %s35_s25 = sshll.u32 %s1656_s24, 4  ;;  %s1657_s29 = smov 384   ;;  %s36_s25 = int_to_ptr.vmem [resolvable:$true] %s35_s25 }
   0x4   :  { %s1658_s30 = smov 24   ;;  %s1659_s7 = smov [#allocation4]  }
   0x5   :  { %41 = dma.hbm_to_vmem [thread:$0]  %s34_s23, 1536, %s36_s25, [#allocation8], %s1657_s29, %s1657_s29, %s1658_s30  }
   0x6   :  { %s22_s8 = sshll.u32 %s1659_s7, 4  ;;  %s1660_s9 = smov 128   ;;  %s23_s8 = int_to_ptr.vmem [resolvable:$true] %s22_s8 }
   0x7   :  { %s1661_s10 = smov 8   ;;  %s46_s12 = sshll.u32 %s2538_s3, 4  ;;  %s47_s12 = int_to_ptr.hbm [resolvable:$true] %s46_s12 }
   0x8   :  { %28 = dma.hbm_to_vmem [thread:$0]  %s21_s28, 1024, %s23_s8, [#allocation5], %s1660_s9, %s1660_s9, %s1661_s10  }
   0x9   :  { %s1662_s13 = smov [#allocation9]  }
   0xa   :  { %s48_s14 = sshll.u32 %s1662_s13, 4  ;;  %s49_s14 = int_to_ptr.vmem [resolvable:$true] %s48_s14 }
   0xb   :  { %54 = dma.hbm_to_vmem [thread:$0]  %s47_s12, 6144, %s49_s14, [#allocation8], %s1657_s29, %s1657_s29, %s1658_s30  }
   0xc   :  { %1650 = dma.done.wait [#allocation5], 1024  }
   0xd   :  { %1651 = vsyncadd [#allocation5], 4294966272 }
   0xe   :  { %1652 = dma.done.wait [#allocation8], 7680  }
   0xf   :  { %1653 = vsyncadd [#allocation8], 4294959616  ;;  %v1710_v0 = vld [vmem:[#allocation9 + $0x168] sm:$0xff]  ;;  %v1712_v1 = vld [vmem:[#allocation9 + $0x150] sm:$0xff]  ;;  %vm104_vm0 = vcmask 261120   ;;  %v2542_v46 = vmov 0.0  }
  0x10   :  { %v93_v2 = vld [vmem:[#allocation7 + $0x48] sm:$0xff]  ;;  %338 = vmatpush.msra.mxu3 %v1710_v0  ;;  %v90_v3 = vld [vmem:[#allocation7 + $0x30] sm:$0xff]  ;;  %v1715_v4 = vld [vmem:[#allocation9 + $0x138] sm:$0xff]  ;;  %v1664_v52 = vmov 0   ;;  %s1345_s22 = sshll.u32 %s2541_s6, 4  ;;  %s1346_s22 = int_to_ptr.hbm [resolvable:$true] %s1345_s22 }
  0x11   :  { %141 = vmatpush.msra.mxu0 %v93_v2  ;;  %v87_v5 = vld [vmem:[#allocation7 + $0x18] sm:$0xff]  ;;  %1404 = vmatpush.msra.mxu2 %v93_v2  ;;  %v1718_v6 = vld [vmem:[#allocation9 + $0x120] sm:$0xff]  ;;  %v1723_v9 = vld [vmem:[#allocation9 + $0x108] sm:$0xff] }
  0x12   :  { %339 = vmatpush.msra.mxu3 %v1712_v1  ;;  %v84_v7 = vld [vmem:[#allocation7] sm:$0xff]  ;;  %v1726_v10 = vld [vmem:[#allocation9 + $0xf0] sm:$0xff]  ;;  %v1730_v11 = vld [vmem:[#allocation9 + $0x178] sm:$0xff]  ;;  %1422 = vset.pattern.permute.xlu0 %v1664_v52 }
  0x13   :  { %142 = vmatpush.msra.mxu0 %v90_v3  ;;  %1405 = vmatpush.msra.mxu2 %v90_v3  ;;  %v1721_v8 = vld [vmem:[#allocation4] sm:$0xff]  ;;  %v1736_v13 = vld [vmem:[#allocation9 + $0xd8] sm:$0xff]  ;;  %v1738_v14 = vld [vmem:[#allocation9 + $0x148] sm:$0xff] }
  0x14   :  { %340 = vmatpush.msra.mxu3 %v1715_v4  ;;  %v1734_v12 = vld [vmem:[#allocation9 + $0x160] sm:$0xff]  ;;  %v1744_v16 = vld [vmem:[#allocation9 + $0x130] sm:$0xff]  ;;  %v1747_v17 = vld [vmem:[#allocation4 + $0x8] sm:$0xff]  ;;  %1423 = vset.pattern.permute.xlu1 %v1664_v52 }
  0x15   :  { %143 = vmatpush.msra.mxu0 %v87_v5  ;;  %1406 = vmatpush.msra.mxu2 %v87_v5  ;;  %v1742_v15 = vld [vmem:[#allocation9 + $0xc0] sm:$0xff]  ;;  %v1750_v18 = vld [vmem:[#allocation9 + $0xa8] sm:$0xff]  ;;  %v1752_v19 = vld [vmem:[#allocation9 + $0x118] sm:$0xff] }
  0x16   :  { %341 = vmatpush.msra.mxu3 %v1718_v6  ;;  %v1756_v20 = vld [vmem:[#allocation4 + $0x38] sm:$0xff]  ;;  %v1758_v21 = vld [vmem:[#allocation9 + $0x90] sm:$0xff]  ;;  %v1762_v22 = vld [vmem:[#allocation9 + $0x100] sm:$0xff]  ;;  %1424 = vset.pattern.permute.xlu2 %v1664_v52 }
  0x17   :  { %144 = vmatpush.msra.mxu0 %v84_v7  ;;  %1407 = vmatpush.msra.mxu2 %v84_v7  ;;  %v94_v23 = vld [vmem:[#allocation7 + $0x50] sm:$0xff]  ;;  %v1768_v24 = vld [vmem:[#allocation9 + $0x78] sm:$0xff]  ;;  %v1770_v25 = vld [vmem:[#allocation9 + $0xe8] sm:$0xff] }
  0x18   :  { %1356 = vmatmul.msk.f32.vlgmr.msra.gmra.mxu0 %vm104_vm0, %v1721_v8  ;;  %342 = vmatpush.msra.mxu3 %v1723_v9  ;;  %v91_v26 = vld [vmem:[#allocation7 + $0x38] sm:$0xff]  ;;  %v1774_v27 = vld [vmem:[#allocation9 + $0x60] sm:$0xff]  ;;  %v1776_v28 = vld [vmem:[#allocation9 + $0xd0] sm:$0xff] }
  0x19   :  { %378 = vmatpush.msrb.mxu0 %v1730_v11  ;;  %1363 = vmatmul.msk.f32.vlgmr.msra.gmra.mxu2 %vm104_vm0, %v1756_v20  ;;  %v1779_v29 = vld [vmem:[#allocation4 + $0x10] sm:$0xff]  ;;  %v88_v30 = vld [vmem:[#allocation7 + $0x20] sm:$0xff]  ;;  %v1782_v31 = vld [vmem:[#allocation9 + $0x48] sm:$0xff] }
  0x1a   :  { %343 = vmatpush.msra.mxu3 %v1726_v10  ;;  %1408 = vmatpush.msrb.mxu2 %v94_v23  ;;  %v1784_v32 = vld [vmem:[#allocation9 + $0xb8] sm:$0xff]  ;;  %v85_v33 = vld [vmem:[#allocation7 + $0x8] sm:$0xff]  ;;  %v1788_v34 = vld [vmem:[#allocation9 + $0x30] sm:$0xff] }
  0x1b   :  { %379 = vmatpush.msrb.mxu0 %v1734_v12  ;;  %182 = vmatpush.msra.mxu1 %v94_v23  ;;  %v1792_v35 = vld [vmem:[#allocation9 + $0xa0] sm:$0xff]  ;;  %v95_v36 = vld [vmem:[#allocation7 + $0x58] sm:$0xff]  ;;  %v1800_v38 = vld [vmem:[#allocation9 + $0x88] sm:$0xff] }
  0x1c   :  { %344 = vmatpush.msra.mxu3 %v1736_v13  ;;  %1409 = vmatpush.msrb.mxu2 %v91_v26  ;;  %v1796_v37 = vld [vmem:[#allocation9 + $0x18] sm:$0xff]  ;;  %v92_v39 = vld [vmem:[#allocation7 + $0x40] sm:$0xff]  ;;  %v1806_v41 = vld [vmem:[#allocation9 + $0x70] sm:$0xff] }
  0x1d   :  { %380 = vmatpush.msrb.mxu0 %v1738_v14  ;;  %183 = vmatpush.msra.mxu1 %v91_v26  ;;  %2575 = vst [vmem:[#allocation14_spill] sm:$0xff] %v1796_v37  ;;  %v1804_v40 = vld [vmem:[#allocation9] sm:$0xff]  ;;  %v1811_v42 = vld [vmem:[#allocation4 + $0x18] sm:$0xff]  ;;  %v1814_v43 = vld [vmem:[#allocation9 + $0x170] sm:$0xff] }
  0x1e   :  { %345 = vmatpush.msra.mxu3 %v1742_v15  ;;  %1410 = vmatpush.msrb.mxu2 %v88_v30  ;;  %2576 = vst [vmem:[#allocation15_spill] sm:$0xff] %v1804_v40  ;;  %v89_v44 = vld [vmem:[#allocation7 + $0x28] sm:$0xff]  ;;  %v1819_v45 = vld [vmem:[#allocation9 + $0x58] sm:$0xff]  ;;  %v86_v48 = vld [vmem:[#allocation7 + $0x10] sm:$0xff] }
  0x1f   :  { %381 = vmatpush.msrb.mxu0 %v1744_v16  ;;  %184 = vmatpush.msra.mxu1 %v88_v30  ;;  %v1822_v47 = vld [vmem:[#allocation9 + $0x158] sm:$0xff]  ;;  %v1829_v49 = vld [vmem:[%s2535_s0] sm:$0xff]  ;;  %v1841_v54 = vld [vmem:[#allocation9 + $0x28] sm:$0xff] }
  0x20   :  { %1357 = vmatmul.msk.f32.gmra.mxu0 %vm104_vm0, %v1747_v17  ;;  %346 = vmatpush.msra.mxu3 %v1750_v18  ;;  %2577 = vst [vmem:[#allocation16_spill] sm:$0xff] %v1829_v49  ;;  %v1832_v50 = vld [vmem:[#allocation9 + $0x40] sm:$0xff]  ;;  %vm447_vm1 = vcmp.gt.f32.partialorder %v1829_v49, 0.0  ;;  %v1843_v55 = vld [vmem:[#allocation9 + $0x128] sm:$0xff]  ;;  %v1851_v57 = vld [vmem:[#allocation9 + $0x110] sm:$0xff]  ;;  %vm572_vm2 = vcmp.gt.f32.partialorder %v1829_v49, 1.0 }
  0x21   :  { %382 = vmatpush.msrb.mxu0 %v1752_v19  ;;  %1411 = vmatpush.msrb.mxu2 %v85_v33  ;;  %v1835_v51 = vld [vmem:[#allocation9 + $0x140] sm:$0xff]  ;;  %v1382_v53 = vsel %vm447_vm1, 1.0, %v2542_v46  ;;  %2578 = vst [vmem:[#allocation17_spill] sm:$0xff] %v1841_v54  ;;  %v1854_v58 = vld [vmem:[#allocation9 + $0x10] sm:$0xff]  ;;  %v1860_v59 = vld [vmem:[#allocation9 + $0xf8] sm:$0xff]  ;;  %v1385_v61 = vsel %vm572_vm2, 1.0, %v2542_v46 }
  0x22   :  { %347 = vmatpush.msra.mxu3 %v1758_v21  ;;  %1371 = vmatmul.msk.f32.vlgmr.msrb.gmra.mxu2 %vm104_vm0, %v1756_v20  ;;  %v1849_v56 = vld [vmem:[#allocation4 + $0x20] sm:$0xff]  ;;  %2579 = vst [vmem:[#allocation18_spill] sm:$0xff] %v1854_v58  ;;  %v1875_v62 = vld [vmem:[#allocation9 + $0xc8] sm:$0xff]  ;;  %v1883_v2 = vld [vmem:[#allocation9 + $0xb0] sm:$0xff]  ;;  %vm1197_vm3 = vcmp.gt.f32.partialorder %v1829_v49, 6.0 }
  0x23   :  { %383 = vmatpush.msrb.mxu0 %v1762_v22  ;;  %185 = vmatpush.msra.mxu1 %v85_v33  ;;  %v1867_v60 = vld [vmem:[#allocation9 + $0xe0] sm:$0xff]  ;;  %v1881_v63 = vld [vmem:[#allocation4 + $0x28] sm:$0xff]  ;;  %v1890_v3 = vld [vmem:[#allocation9 + $0x98] sm:$0xff]  ;;  %v1400_v7 = vsel %vm1197_vm3, 1.0, %v2542_v46 }
  0x24   :  { %348 = vmatpush.msra.mxu3 %v1768_v24  ;;  %223 = vmatpush.msra.mxu2 %v95_v36  ;;  %v1897_v5 = vld [vmem:[#allocation9 + $0x80] sm:$0xff]  ;;  %v1913_v23 = vld [vmem:[#allocation9 + $0x50] sm:$0xff]  ;;  %v1919_v26 = vld [vmem:[#allocation9 + $0x38] sm:$0xff] }
  0x25   :  { %384 = vmatpush.msrb.mxu0 %v1770_v25  ;;  %1364 = vmatmul.msk.f32.vlgmr.msra.gmra.mxu1 %vm104_vm0, %v1721_v8  ;;  %2580 = vst [vmem:[#allocation19_spill] sm:$0xff] %v1919_v26  ;;  %v1933_v30 = vld [vmem:[#allocation9 + $0x8] sm:$0xff]  ;;  %v96_v33 = vld [vmem:[%s2539_s4] sm:$0x7] }
  0x26   :  { %349 = vmatpush.msra.mxu3 %v1774_v27  ;;  %224 = vmatpush.msra.mxu2 %v92_v39  ;;  %2582 = vst [vmem:[#allocation21_spill] sm:$0xff] %v1933_v30  ;;  %v98_v36 = vperm.slane %v96_v33, 0 }
  0x27   :  { %385 = vmatpush.msrb.mxu0 %v1776_v28  ;;  %462 = vmatpush.msrb.mxu1 %v1710_v0 }
  0x28   :  { %1358 = vmatmul.msk.f32.gmra.mxu0 %vm104_vm0, %v1779_v29  ;;  %350 = vmatpush.msra.mxu3 %v1782_v31 }
  0x29   :  { %386 = vmatpush.msrb.mxu0 %v1784_v32  ;;  %225 = vmatpush.msra.mxu2 %v89_v44 }
  0x2a   :  { %351 = vmatpush.msra.mxu3 %v1788_v34  ;;  %453 = vperm.xlu0 %1422, %v1382_v53  }
  0x2b   :  { %387 = vmatpush.msrb.mxu0 %v1792_v35  ;;  %226 = vmatpush.msra.mxu2 %v86_v48 }
  0x2c   :  { %352 = vmatpush.msra.mxu3 %v1796_v37  ;;  %1372 = vmatmul.msk.f32.vlgmr.msra.gmra.mxu2 %vm104_vm0, %v1721_v8  ;;  %v1905_v8 = vld [vmem:[#allocation9 + $0x68] sm:$0xff] }
  0x2d   :  { %388 = vmatpush.msrb.mxu0 %v1800_v38  ;;  %482 = vmatpush.msrb.mxu2 %v1814_v43 }
  0x2e   :  { %353 = vmatpush.msra.mxu3 %v1804_v40  ;;  %463 = vmatpush.msrb.mxu1 %v1712_v1 }
  0x2f   :  { %389 = vmatpush.msrb.mxu0 %v1806_v41  ;;  %354 = vmatmul.f32.vlgmr.msra.gmra.mxu3 %v2542_v46 }
  0x30   :  { %1359 = vmatmul.msk.f32.gmra.mxu0 %vm104_vm0, %v1811_v42  ;;  %358 = vmatpush.msrb.mxu3 %v1814_v43 }
  0x31   :  { %390 = vmatpush.msrb.mxu0 %v1819_v45  ;;  %483 = vmatpush.msrb.mxu2 %v1822_v47 }
  0x32   :  { %359 = vmatpush.msrb.mxu3 %v1822_v47  ;;  %464 = vmatpush.msrb.mxu1 %v1715_v4 }
  0x33   :  { %391 = vmatpush.msrb.mxu0 %v1832_v50  ;;  %484 = vmatpush.msrb.mxu2 %v1835_v51 }
  0x34   :  { %360 = vmatpush.msrb.mxu3 %v1835_v51  ;;  %1365 = vmatmul.msk.f32.gmra.mxu1 %vm104_vm0, %v1747_v17 }
  0x35   :  { %392 = vmatpush.msrb.mxu0 %v1841_v54  ;;  %1373 = vmatmul.msk.f32.gmra.mxu2 %vm104_vm0, %v1747_v17  ;;  %v1911_v17 = vld [vmem:[#allocation4 + $0x30] sm:$0xff] }
  0x36   :  { %361 = vmatpush.msrb.mxu3 %v1843_v55  ;;  %465 = vmatpush.msrb.mxu1 %v1718_v6 }
  0x37   :  { %393 = vmatpush.msrb.mxu0 %v1854_v58  ;;  %578 = vperm.xlu0 %1422, %v1385_v61   ;;  %v324_v61 = vld [vmem:[%s2540_s5] sm:$0x7] }
  0x38   :  { %1360 = vmatmul.msk.f32.gmra.mxu0 %vm104_vm0, %v1849_v56  ;;  %362 = vmatpush.msrb.mxu3 %v1851_v57 }
  0x39   :  { %485 = vmatpush.msrb.mxu2 %v1843_v55  ;;  %466 = vmatpush.msrb.mxu1 %v1723_v9 }
  0x3a   :  { %363 = vmatpush.msrb.mxu3 %v1860_v59  ;;  %587 = vmatpush.msra.mxu0 %v1710_v0 }
  0x3b   :  { %486 = vmatpush.msrb.mxu2 %v1851_v57  ;;  %467 = vmatpush.msrb.mxu1 %v1726_v10 }
  0x3c   :  { %364 = vmatpush.msrb.mxu3 %v1867_v60  ;;  %588 = vmatpush.msra.mxu0 %v1712_v1 }
  0x3d   :  { %487 = vmatpush.msrb.mxu2 %v1860_v59  ;;  %1366 = vmatmul.msk.f32.gmra.mxu1 %vm104_vm0, %v1779_v29 }
  0x3e   :  { %365 = vmatpush.msrb.mxu3 %v1875_v62  ;;  %1374 = vmatmul.msk.f32.gmra.mxu2 %vm104_vm0, %v1779_v29  ;;  %v1926_v29 = vld [vmem:[#allocation9 + $0x20] sm:$0xff] }
  0x3f   :  { %468 = vmatpush.msrb.mxu1 %v1736_v13  ;;  %1203 = vperm.xlu0 %1422, %v1400_v7   ;;  %2581 = vst [vmem:[#allocation20_spill] sm:$0xff] %v1926_v29  ;;  %v2077_v7 = vperm.slane %v324_v61, 0 }
  0x40   :  { %1361 = vmatmul.msk.f32.gmra.mxu0 %vm104_vm0, %v1881_v63  ;;  %366 = vmatpush.msrb.mxu3 %v1883_v2 }
  0x41   :  { %488 = vmatpush.msrb.mxu2 %v1867_v60  ;;  %469 = vmatpush.msrb.mxu1 %v1742_v15  ;;  %2587 = vst [vmem:[#allocation26_spill] sm:$0xff] %v2077_v7 }
  0x42   :  { %367 = vmatpush.msrb.mxu3 %v1890_v3  ;;  %589 = vmatpush.msra.mxu0 %v1715_v4 }
  0x43   :  { %489 = vmatpush.msrb.mxu2 %v1875_v62  ;;  %470 = vmatpush.msrb.mxu1 %v1750_v18 }
  0x44   :  { %368 = vmatpush.msrb.mxu3 %v1897_v5  ;;  %590 = vmatpush.msra.mxu0 %v1718_v6 }
  0x45   :  { %490 = vmatpush.msrb.mxu2 %v1883_v2  ;;  %1367 = vmatmul.msk.f32.gmra.mxu1 %vm104_vm0, %v1811_v42 }
  0x46   :  { %369 = vmatpush.msrb.mxu3 %v1905_v8  ;;  %1375 = vmatmul.msk.f32.gmra.mxu2 %vm104_vm0, %v1811_v42 }
  0x47   :  { %471 = vmatpush.msrb.mxu1 %v1758_v21  ;;  %491 = vmatpush.msrb.mxu2 %v1890_v3 }
  0x48   :  { %1362 = vmatmul.msk.f32.gmra.mxu0 %vm104_vm0, %v1911_v17  ;;  %370 = vmatpush.msrb.mxu3 %v1913_v23 }
  0x49   :  { %472 = vmatpush.msrb.mxu1 %v1768_v24  ;;  %591 = vmatpush.msra.mxu0 %v1723_v9 }
  0x4a   :  { %371 = vmatpush.msrb.mxu3 %v1919_v26  ;;  %492 = vmatpush.msrb.mxu2 %v1897_v5 }
  0x4b   :  { %473 = vmatpush.msrb.mxu1 %v1774_v27  ;;  %592 = vmatpush.msra.mxu0 %v1726_v10 }
  0x4c   :  { %372 = vmatpush.msrb.mxu3 %v1926_v29  ;;  %493 = vmatpush.msrb.mxu2 %v1905_v8 }
  0x4d   :  { %1368 = vmatmul.msk.f32.gmra.mxu1 %vm104_vm0, %v1849_v56  ;;  %593 = vmatpush.msra.mxu0 %v1736_v13 }
  0x4e   :  { %373 = vmatpush.msrb.mxu3 %v1933_v30  ;;  %1376 = vmatmul.msk.f32.gmra.mxu2 %vm104_vm0, %v1849_v56 }
  0x4f   :  { %374 = vmatmul.f32.vlgmr.msrb.gmra.mxu3 %v2542_v46  ;;  %474 = vmatpush.msrb.mxu1 %v1782_v31 }
  0x50   :  { %394 = vmatmul.f32.vlgmr.msrb.gmra.mxu0 %v2542_v46  ;;  %502 = vmatpush.msra.mxu3 %v1730_v11 }
  0x51   :  { %494 = vmatpush.msrb.mxu2 %v1913_v23  ;;  %475 = vmatpush.msrb.mxu1 %v1788_v34 }
  0x52   :  { %503 = vmatpush.msra.mxu3 %v1734_v12  ;;  %594 = vmatpush.msra.mxu0 %v1742_v15 }
  0x53   :  { %495 = vmatpush.msrb.mxu2 %v1919_v26  ;;  %476 = vmatpush.msrb.mxu1 %v1796_v37 }
  0x54   :  { %504 = vmatpush.msra.mxu3 %v1738_v14  ;;  %595 = vmatpush.msra.mxu0 %v1750_v18 }
  0x55   :  { %496 = vmatpush.msrb.mxu2 %v1926_v29  ;;  %477 = vmatpush.msrb.mxu1 %v1804_v40 }
  0x56   :  { %505 = vmatpush.msra.mxu3 %v1744_v16  ;;  %1369 = vmatmul.msk.f32.gmra.mxu1 %vm104_vm0, %v1881_v63 }
  0x57   :  { %1377 = vmatmul.msk.f32.gmra.mxu2 %vm104_vm0, %v1881_v63  ;;  %607 = vmatpush.msra.mxu1 %v1814_v43 }
  0x58   :  { %506 = vmatpush.msra.mxu3 %v1752_v19  ;;  %497 = vmatpush.msrb.mxu2 %v1933_v30 }
  0x59   :  { %608 = vmatpush.msra.mxu1 %v1822_v47  ;;  %596 = vmatpush.msra.mxu0 %v1758_v21 }
  0x5a   :  { %507 = vmatpush.msra.mxu3 %v1762_v22  ;;  %627 = vmatpush.msra.mxu2 %v1730_v11 }
  0x5b   :  { %609 = vmatpush.msra.mxu1 %v1835_v51  ;;  %597 = vmatpush.msra.mxu0 %v1768_v24 }
  0x5c   :  { %508 = vmatpush.msra.mxu3 %v1770_v25  ;;  %628 = vmatpush.msra.mxu2 %v1734_v12 }
  0x5d   :  { %610 = vmatpush.msra.mxu1 %v1843_v55  ;;  %598 = vmatpush.msra.mxu0 %v1774_v27 }
  0x5e   :  { %509 = vmatpush.msra.mxu3 %v1776_v28  ;;  %629 = vmatpush.msra.mxu2 %v1738_v14 }
  0x5f   :  { %1370 = vmatmul.msk.f32.gmra.mxu1 %vm104_vm0, %v1911_v17  ;;  %1378 = vmatmul.msk.f32.gmra.mxu2 %vm104_vm0, %v1911_v17 }
  0x60   :  { %510 = vmatpush.msra.mxu3 %v1784_v32  ;;  %611 = vmatpush.msra.mxu1 %v1851_v57 }
  0x61   :  { %630 = vmatpush.msra.mxu2 %v1744_v16  ;;  %599 = vmatpush.msra.mxu0 %v1782_v31 }
  0x62   :  { %511 = vmatpush.msra.mxu3 %v1792_v35  ;;  %612 = vmatpush.msra.mxu1 %v1860_v59 }
  0x63   :  { %631 = vmatpush.msra.mxu2 %v1752_v19  ;;  %600 = vmatpush.msra.mxu0 %v1788_v34 }
  0x64   :  { %512 = vmatpush.msra.mxu3 %v1800_v38  ;;  %613 = vmatpush.msra.mxu1 %v1867_v60 }
  0x65   :  { %632 = vmatpush.msra.mxu2 %v1762_v22  ;;  %601 = vmatpush.msra.mxu0 %v1796_v37 }
  0x66   :  { %513 = vmatpush.msra.mxu3 %v1806_v41  ;;  %614 = vmatpush.msra.mxu1 %v1875_v62 }
  0x67   :  { %633 = vmatpush.msra.mxu2 %v1770_v25  ;;  %602 = vmatpush.msra.mxu0 %v1804_v40 }
  0x68   :  { %514 = vmatpush.msra.mxu3 %v1819_v45  ;;  %1379 = vmatmul.msk.f32.gmra.mxu2 %vm104_vm0, %v1756_v20 }
  0x69   :  { %615 = vmatpush.msra.mxu1 %v1883_v2  ;;  %634 = vmatpush.msra.mxu2 %v1776_v28 }
  0x6a   :  { %515 = vmatpush.msra.mxu3 %v1832_v50  ;;  %732 = vmatpush.msrb.mxu0 %v1814_v43 }
  0x6b   :  { %616 = vmatpush.msra.mxu1 %v1890_v3  ;;  %635 = vmatpush.msra.mxu2 %v1784_v32 }
  0x6c   :  { %516 = vmatpush.msra.mxu3 %v1841_v54  ;;  %733 = vmatpush.msrb.mxu0 %v1822_v47 }
  0x6d   :  { %617 = vmatpush.msra.mxu1 %v1897_v5  ;;  %636 = vmatpush.msra.mxu2 %v1792_v35 }
  0x6e   :  { %517 = vmatpush.msra.mxu3 %v1854_v58  ;;  %734 = vmatpush.msrb.mxu0 %v1835_v51 }
  0x6f   :  { %618 = vmatpush.msra.mxu1 %v1905_v8  ;;  %637 = vmatpush.msra.mxu2 %v1800_v38 }
  0x70   :  { %712 = vmatpush.msrb.mxu3 %v1710_v0  ;;  %735 = vmatpush.msrb.mxu0 %v1843_v55 }
  0x71   :  { %619 = vmatpush.msra.mxu1 %v1913_v23  ;;  %638 = vmatpush.msra.mxu2 %v1806_v41 }
  0x72   :  { %713 = vmatpush.msrb.mxu3 %v1712_v1  ;;  %736 = vmatpush.msrb.mxu0 %v1851_v57 }
  0x73   :  { %620 = vmatpush.msra.mxu1 %v1919_v26  ;;  %639 = vmatpush.msra.mxu2 %v1819_v45 }
  0x74   :  { %714 = vmatpush.msrb.mxu3 %v1715_v4  ;;  %737 = vmatpush.msrb.mxu0 %v1860_v59 }
  0x75   :  { %621 = vmatpush.msra.mxu1 %v1926_v29  ;;  %640 = vmatpush.msra.mxu2 %v1832_v50 }
  0x76   :  { %715 = vmatpush.msrb.mxu3 %v1718_v6  ;;  %738 = vmatpush.msrb.mxu0 %v1867_v60 }
  0x77   :  { %622 = vmatpush.msra.mxu1 %v1933_v30  ;;  %641 = vmatpush.msra.mxu2 %v1841_v54 }
  0x78   :  { %716 = vmatpush.msrb.mxu3 %v1723_v9  ;;  %739 = vmatpush.msrb.mxu0 %v1875_v62 }
  0x79   :  { %642 = vmatpush.msra.mxu2 %v1854_v58 }
  0x7a   :  { %717 = vmatpush.msrb.mxu3 %v1726_v10  ;;  %740 = vmatpush.msrb.mxu0 %v1883_v2 }
  0x7c   :  { %718 = vmatpush.msrb.mxu3 %v1736_v13  ;;  %741 = vmatpush.msrb.mxu0 %v1890_v3 }
  0x7e   :  { %719 = vmatpush.msrb.mxu3 %v1742_v15  ;;  %742 = vmatpush.msrb.mxu0 %v1897_v5 }
  0x80   :  { %720 = vmatpush.msrb.mxu3 %v1750_v18  ;;  %743 = vmatpush.msrb.mxu0 %v1905_v8 }
  0x82   :  { %721 = vmatpush.msrb.mxu3 %v1758_v21  ;;  %744 = vmatpush.msrb.mxu0 %v1913_v23 }
  0x84   :  { %722 = vmatpush.msrb.mxu3 %v1768_v24  ;;  %745 = vmatpush.msrb.mxu0 %v1919_v26 }
  0x86   :  { %723 = vmatpush.msrb.mxu3 %v1774_v27  ;;  %746 = vmatpush.msrb.mxu0 %v1926_v29  ;;  %v2086_v29 = vperm.slane %v96_v33, 1 }
  0x88   :  { %724 = vmatpush.msrb.mxu3 %v1782_v31  ;;  %747 = vmatpush.msrb.mxu0 %v1933_v30  ;;  %2591 = vst [vmem:[#allocation30_spill] sm:$0xff] %v2086_v29 }
  0x8a   :  { %725 = vmatpush.msrb.mxu3 %v1788_v34 }
  0x8c   :  { %726 = vmatpush.msrb.mxu3 %v1796_v37 }
  0x8e   :  { %727 = vmatpush.msrb.mxu3 %v1804_v40 }
  0x95   :  { %v146_v20 = vpop.f32.mrf.mxu0 }
  0x96   :  { %v147_v46 = vadd.f32 %v146_v20, %v98_v36 }
  0x9c   :  { %v167_v44 = vpop.f32.mrf.mxu2 }
  0x9d   :  { %v149_v39 = vpop.f32.mrf.mxu0  ;;  %v2068_v48 = vadd.f32 %v167_v44, %v98_v36 }
  0x9e   :  { %v2066_v42 = vadd.f32 %v149_v39, %v98_v36 }
  0x9f   :  { %2584 = vst [vmem:[#allocation23_spill] sm:$0xff] %v2068_v48 }
  0xa0   :  { %2583 = vst [vmem:[#allocation22_spill] sm:$0xff] %v2066_v42 }
  0xa2   :  { %v187_v20 = vpop.f32.mrf.mxu1 }
  0xa5   :  { %v152_v52 = vpop.f32.mrf.mxu0 }
  0xa6   :  { %v2070_v53 = vadd.f32 %v152_v52, %v98_v36 }
  0xa8   :  { %2585 = vst [vmem:[#allocation24_spill] sm:$0xff] %v2070_v53 }
  0xad   :  { %v155_v56 = vpop.f32.mrf.mxu0 }
  0xae   :  { %v2075_v63 = vadd.f32 %v155_v56, %v98_v36 }
  0xb0   :  { %2586 = vst [vmem:[#allocation25_spill] sm:$0xff] %v2075_v63 }
  0xb2   :  { %v355_v17 = vpop.f32.mrf.mxu3 }
  0xb3   :  { %v356_v39 = vadd.f32 %v355_v17, %v2077_v7  ;;  %v2088_v17 = vperm.slane %v324_v61, 1 }
  0xb5   :  { %v158_v49 = vpop.f32.mrf.mxu0  ;;  %v398_v42 = vadd.f32 %v356_v39, %v147_v46  ;;  %2592 = vst [vmem:[#allocation31_spill] sm:$0xff] %v2088_v17 }
  0xb6   :  { %v2080_v44 = vadd.f32 %v158_v49, %v98_v36  ;;  %v188_v49 = vadd.f32 %v187_v20, %v2086_v29 }
  0xb7   :  { %v1380_v48 = vmul.f32 -1.442695, %v398_v42 }
  0xb8   :  { %2588 = vst [vmem:[#allocation27_spill] sm:$0xff] %v2080_v44  ;;  %v2092_v44 = vpop.f32.mrf.mxu2 }
  0xb9   :  { %1425 = vpow2.f32 %v1380_v48  ;;  %2593 = vst [vmem:[#allocation32_spill] sm:$0xff] %v2092_v44 }
  0xbd   :  { %v161_v52 = vpop.f32.mrf.mxu0 }
  0xbe   :  { %v2082_v53 = vadd.f32 %v161_v52, %v98_v36 }
  0xbf   :  { %v1426_v30 = vpop.eup %1425 }
  0xc0   :  { %2589 = vst [vmem:[#allocation28_spill] sm:$0xff] %v2082_v53  ;;  %v402_v40 = vadd.f32 1.0, %v1426_v30 }
  0xc2   :  { %1427 = vrcp.f32 %v402_v40  ;;  %vm408_vm5 = vweird.f32 %v402_v40  ;;  %v412_v7 = vand.u32 2147483647, %v402_v40 }
  0xc4   :  { %vm413_vm7 = vcmp.eq.f32.partialorder %v412_v7, 8.507059e+37 }
  0xc5   :  { %v164_v58 = vpop.f32.mrf.mxu0 }
  0xc6   :  { %v2084_v56 = vadd.f32 %v164_v58, %v98_v36  ;;  %v414_v36 = vand.u32 2147483648, %v402_v40 }
  0xc8   :  { %2590 = vst [vmem:[#allocation29_spill] sm:$0xff] %v2084_v56  ;;  %v1428_v63 = vpop.eup %1427  ;;  %v2094_v56 = vperm.slane %v324_v61, 2 }
  0xc9   :  { %v404_v46 = vmul.f32 %v1428_v63, %v402_v40  ;;  %vm409_vm4 = vweird.f32 %v1428_v63 }
  0xca   :  { %vm410_vm6 = vmor %vm408_vm5, %vm409_vm4 }
  0xcb   :  { %v405_v39 = vsub.f32 1.0, %v404_v46 }
  0xcd   :  { %v406_v30 = vmul.f32 %v1428_v63, %v405_v39  ;;  %v395_v54 = vpop.f32.mrf.mxu0 }
  0xce   :  { %v396_v46 = vadd.f32 %v395_v54, %v2094_v56 }
  0xcf   :  { %v407_v58 = vadd.f32 %v1428_v63, %v406_v30 }
  0xd1   :  { %v411_v20 = vsel %vm410_vm6, %v1428_v63, %v407_v58 }
  0xd2   :  { %v375_v42 = vpop.f32.mrf.mxu3 }
  0xd3   :  { %v376_v48 = vadd.f32 %v375_v42, %v2088_v17  ;;  %v415_v42 = vor.u32 1.1754944e-38, %v414_v36 }
  0xd5   :  { %v418_v52 = vadd.f32 %v376_v48, %v188_v49  ;;  %v2097_v49 = vperm.slane %v96_v33, 2  ;;  %v228_v48 = vpop.f32.mrf.mxu2 }
  0xd7   :  { %v1381_v53 = vmul.f32 -1.442695, %v418_v52  ;;  %v229_v61 = vadd.f32 %v228_v48, %v2097_v49 }
  0xd9   :  { %1429 = vpow2.f32 %v1381_v53  ;;  %v416_v53 = vsel %vm413_vm7, %v415_v42, %v411_v20 }
  0xda   :  { %v438_v39 = vmul.f32 %v416_v53, %v396_v46  ;;  %v454_v53 = vpop.permute.xlu0 %453 }
  0xdc   :  { %v439_v40 = vadd.f32 %v438_v39, %v229_v61 }
  0xdf   :  { %v1430_v37 = vpop.eup %1429 }
  0xe0   :  { %v422_v29 = vadd.f32 1.0, %v1430_v37 }
  0xe2   :  { %1431 = vrcp.f32 %v422_v29  ;;  %v434_v17 = vand.u32 2147483648, %v422_v29  ;;  %v432_v37 = vand.u32 2147483647, %v422_v29  ;;  %vm428_vm9 = vweird.f32 %v422_v29 }
  0xe3   :  { %1433 = vtanh.f32 %v439_v40 }
  0xe4   :  { %v435_v54 = vor.u32 1.1754944e-38, %v434_v17  ;;  %vm433_vm11 = vcmp.eq.f32.partialorder %v432_v37, 8.507059e+37 }
  0xe8   :  { %v1432_v52 = vpop.eup %1431 }
  0xe9   :  { %v424_v30 = vmul.f32 %v1432_v52, %v422_v29  ;;  %vm429_vm8 = vweird.f32 %v1432_v52  ;;  %v1434_v36 = vpop.eup %1433 }
  0xea   :  { %vm430_vm10 = vmor %vm428_vm9, %vm429_vm8 }
  0xeb   :  { %v425_v44 = vsub.f32 1.0, %v424_v30 }
  0xed   :  { %v426_v26 = vmul.f32 %v1432_v52, %v425_v44 }
  0xef   :  { %v427_v63 = vadd.f32 %v1432_v52, %v426_v26 }
  0xf1   :  { %v431_v33 = vsel %vm430_vm10, %v1432_v52, %v427_v63 }
  0xf2   :  { %v436_v7 = vsel %vm433_vm11, %v435_v54, %v431_v33  ;;  %v2612_v54 = vld [vmem:[#allocation26_spill] sm:$0xff] }
  0xf3   :  { %v441_v58 = vsub.f32 1.0, %v436_v7  ;;  %v443_v42 = vmul.f32 0.0, %v436_v7  ;;  %v2613_v7 = vld [vmem:[#allocation22_spill] sm:$0xff] }
  0xf5   :  { %v442_v20 = vmul.f32 %v1434_v36, %v441_v58 }
  0xf7   :  { %v444_v46 = vadd.f32 %v443_v42, %v442_v20  ;;  %v2614_v42 = vld [vmem:[#allocation30_spill] sm:$0xff] }
  0xf9   :  { %v2100_v48 = vmul.f32 %v454_v53, %v444_v46  ;;  %v2615_v53 = vld [vmem:[#allocation31_spill] sm:$0xff] }
  0xfb   :  { %478 = vmatmul.f32.vlgmr.msrb.gmra.mxu1 %v2100_v48  ;;  %498 = vmatmul.f32.vlgmr.msrb.gmra.mxu2 %v2100_v48 }
  0xfc   :  { %518 = vmatmul.f32.vlgmr.msra.gmra.mxu3 %v2100_v48  ;;  %752 = vmatpush.msrb.mxu1 %v1730_v11 }
  0xfd   :  { %837 = vmatpush.msrb.mxu2 %v1710_v0  ;;  %857 = vmatpush.msra.mxu3 %v1814_v43  ;;  %v2594_v0 = vld [vmem:[#allocation19_spill] sm:$0xff] }
  0xfe   :  { %753 = vmatpush.msrb.mxu1 %v1734_v12 }
  0xff   :  { %838 = vmatpush.msrb.mxu2 %v1712_v1  ;;  %858 = vmatpush.msra.mxu3 %v1822_v47  ;;  %v2595_v1 = vld [vmem:[#allocation17_spill] sm:$0xff] }
 0x100   :  { %754 = vmatpush.msrb.mxu1 %v1738_v14 }
 0x101   :  { %839 = vmatpush.msrb.mxu2 %v1715_v4  ;;  %859 = vmatpush.msra.mxu3 %v1835_v51  ;;  %v2596_v4 = vld [vmem:[#allocation14_spill] sm:$0xff] }
 0x102   :  { %755 = vmatpush.msrb.mxu1 %v1744_v16 }
 0x103   :  { %840 = vmatpush.msrb.mxu2 %v1718_v6  ;;  %860 = vmatpush.msra.mxu3 %v1843_v55  ;;  %v2597_v6 = vld [vmem:[#allocation20_spill] sm:$0xff] }
 0x104   :  { %756 = vmatpush.msrb.mxu1 %v1752_v19 }
 0x105   :  { %841 = vmatpush.msrb.mxu2 %v1723_v9  ;;  %861 = vmatpush.msra.mxu3 %v1851_v57  ;;  %v2598_v9 = vld [vmem:[#allocation18_spill] sm:$0xff] }
 0x106   :  { %757 = vmatpush.msrb.mxu1 %v1762_v22 }
 0x107   :  { %842 = vmatpush.msrb.mxu2 %v1726_v10  ;;  %862 = vmatpush.msra.mxu3 %v1860_v59  ;;  %v2599_v10 = vld [vmem:[#allocation15_spill] sm:$0xff] }
 0x108   :  { %758 = vmatpush.msrb.mxu1 %v1770_v25 }
 0x109   :  { %843 = vmatpush.msrb.mxu2 %v1736_v13  ;;  %863 = vmatpush.msra.mxu3 %v1867_v60  ;;  %v2600_v13 = vld [vmem:[#allocation21_spill] sm:$0xff] }
 0x10a   :  { %759 = vmatpush.msrb.mxu1 %v1776_v28 }
 0x10b   :  { %844 = vmatpush.msrb.mxu2 %v1742_v15  ;;  %864 = vmatpush.msra.mxu3 %v1875_v62  ;;  %v231_v15 = vpop.f32.mrf.mxu2 }
 0x10c   :  { %760 = vmatpush.msrb.mxu1 %v1784_v32 }
 0x10d   :  { %845 = vmatpush.msrb.mxu2 %v1750_v18  ;;  %865 = vmatpush.msra.mxu3 %v1883_v2  ;;  %v190_v18 = vpop.f32.mrf.mxu1 }
 0x10e   :  { %761 = vmatpush.msrb.mxu1 %v1792_v35  ;;  %v191_v46 = vadd.f32 %v190_v18, %v2614_v42 }
 0x10f   :  { %846 = vmatpush.msrb.mxu2 %v1758_v21  ;;  %866 = vmatpush.msra.mxu3 %v1890_v3 }
 0x110   :  { %762 = vmatpush.msrb.mxu1 %v1800_v38 }
 0x111   :  { %847 = vmatpush.msrb.mxu2 %v1768_v24  ;;  %867 = vmatpush.msra.mxu3 %v1897_v5 }
 0x112   :  { %763 = vmatpush.msrb.mxu1 %v1806_v41 }
 0x113   :  { %848 = vmatpush.msrb.mxu2 %v1774_v27  ;;  %868 = vmatpush.msra.mxu3 %v1905_v8  ;;  %v2153_v21 = vpop.f32.mrf.mxu2 }
 0x114   :  { %764 = vmatpush.msrb.mxu1 %v1819_v45  ;;  %2601 = vst [vmem:[#allocation19_spill] sm:$0xff] %v2153_v21 }
 0x115   :  { %849 = vmatpush.msrb.mxu2 %v1782_v31  ;;  %869 = vmatpush.msra.mxu3 %v1913_v23  ;;  %v2155_v26 = vpop.f32.mrf.mxu1 }
 0x116   :  { %765 = vmatpush.msrb.mxu1 %v1832_v50  ;;  %2602 = vst [vmem:[#allocation17_spill] sm:$0xff] %v2155_v26 }
 0x117   :  { %850 = vmatpush.msrb.mxu2 %v1788_v34  ;;  %870 = vmatpush.msra.mxu3 %v2594_v0 }
 0x118   :  { %766 = vmatpush.msrb.mxu1 %v2595_v1 }
 0x119   :  { %851 = vmatpush.msrb.mxu2 %v2596_v4  ;;  %871 = vmatpush.msra.mxu3 %v2597_v6 }
 0x11a   :  { %767 = vmatpush.msrb.mxu1 %v2598_v9 }
 0x11b   :  { %852 = vmatpush.msrb.mxu2 %v2599_v10  ;;  %872 = vmatpush.msra.mxu3 %v2600_v13  ;;  %v2157_v29 = vpop.f32.mrf.mxu2 }
 0x11c   :  { %2603 = vst [vmem:[#allocation14_spill] sm:$0xff] %v2157_v29 }
 0x11d   :  { %v2159_v44 = vpop.f32.mrf.mxu1 }
 0x11e   :  { %2604 = vst [vmem:[#allocation20_spill] sm:$0xff] %v2159_v44  ;;  %v2616_v44 = vld [vmem:[#allocation16_spill] sm:$0xff] }
 0x11f   :  { %vm697_vm12 = vcmp.gt.f32.partialorder %v2616_v44, 2.0  ;;  %vm822_vm14 = vcmp.gt.f32.partialorder %v2616_v44, 3.0  ;;  %vm1322_vm4 = vcmp.gt.f32.partialorder %v2616_v44, 7.0 }
 0x123   :  { %v2161_v17 = vpop.f32.mrf.mxu2 }
 0x124   :  { %2605 = vst [vmem:[#allocation18_spill] sm:$0xff] %v2161_v17 }
 0x125   :  { %v2163_v39 = vpop.f32.mrf.mxu1 }
 0x126   :  { %2606 = vst [vmem:[#allocation15_spill] sm:$0xff] %v2163_v39 }
 0x12b   :  { %v2165_v61 = vpop.f32.mrf.mxu2 }
 0x12c   :  { %2607 = vst [vmem:[#allocation33_spill] sm:$0xff] %v2165_v61 }
 0x12d   :  { %v2167_v52 = vpop.f32.mrf.mxu1 }
 0x12e   :  { %2608 = vst [vmem:[#allocation34_spill] sm:$0xff] %v2167_v52 }
 0x133   :  { %v2169_v30 = vpop.f32.mrf.mxu2 }
 0x134   :  { %2609 = vst [vmem:[#allocation35_spill] sm:$0xff] %v2169_v30 }
 0x135   :  { %v2171_v40 = vpop.f32.mrf.mxu1 }
 0x136   :  { %2610 = vst [vmem:[#allocation36_spill] sm:$0xff] %v2171_v40 }
 0x13b   :  { %v2173_v37 = vpop.f32.mrf.mxu2 }
 0x13c   :  { %2611 = vst [vmem:[#allocation37_spill] sm:$0xff] %v2173_v37 }
 0x178   :  { %v479_v63 = vpop.f32.mrf.mxu1 }
 0x179   :  { %v480_v33 = vadd.f32 %v479_v63, %v2612_v54 }
 0x17b   :  { %v522_v58 = vadd.f32 %v480_v33, %v2613_v7  ;;  %v2617_v33 = vmov 0.0  }
 0x17c   :  { %v1388_v7 = vsel %vm697_vm12, 1.0, %v2617_v33 }
 0x17d   :  { %v1383_v36 = vmul.f32 -1.442695, %v522_v58  ;;  %703 = vperm.xlu1 %1423, %v1388_v7   ;;  %v232_v7 = vadd.f32 %v231_v15, %v2097_v49 }
 0x17e   :  { %v499_v20 = vpop.f32.mrf.mxu2 }
 0x17f   :  { %1435 = vpow2.f32 %v1383_v36  ;;  %v500_v61 = vadd.f32 %v499_v20, %v2615_v53 }
 0x181   :  { %v542_v17 = vadd.f32 %v500_v61, %v191_v46  ;;  %v1391_v46 = vsel %vm822_vm14, 1.0, %v2617_v33 }
 0x183   :  { %v1384_v52 = vmul.f32 -1.442695, %v542_v17 }
 0x185   :  { %v1436_v39 = vpop.eup %1435  ;;  %1437 = vpow2.f32 %v1384_v52  ;;  %828 = vperm.xlu1 %1423, %v1391_v46  }
 0x186   :  { %v526_v30 = vadd.f32 1.0, %v1436_v39  ;;  %v519_v39 = vpop.f32.mrf.mxu3 }
 0x187   :  { %v520_v53 = vadd.f32 %v519_v39, %v2094_v56 }
 0x188   :  { %1439 = vrcp.f32 %v526_v30  ;;  %v538_v18 = vand.u32 2147483648, %v526_v30  ;;  %v536_v61 = vand.u32 2147483647, %v526_v30  ;;  %vm532_vm15 = vweird.f32 %v526_v30 }
 0x18a   :  { %vm537_vm1 = vcmp.eq.f32.partialorder %v536_v61, 8.507059e+37 }
 0x18b   :  { %v1438_v40 = vpop.eup %1437 }
 0x18c   :  { %v546_v37 = vadd.f32 1.0, %v1438_v40  ;;  %v539_v40 = vor.u32 1.1754944e-38, %v538_v18 }
 0x18e   :  { %v1440_v29 = vpop.eup %1439  ;;  %1441 = vrcp.f32 %v546_v37  ;;  %v558_v26 = vand.u32 2147483648, %v546_v37  ;;  %v556_v13 = vand.u32 2147483647, %v546_v37  ;;  %vm552_vm3 = vweird.f32 %v546_v37 }
 0x18f   :  { %v528_v63 = vmul.f32 %v1440_v29, %v526_v30  ;;  %vm533_vm13 = vweird.f32 %v1440_v29 }
 0x190   :  { %vm534_vm0 = vmor %vm532_vm15, %vm533_vm13  ;;  %v559_v18 = vor.u32 1.1754944e-38, %v558_v26  ;;  %vm557_vm6 = vcmp.eq.f32.partialorder %v556_v13, 8.507059e+37  ;;  %v2196_v13 = vld [vmem:[#allocation9 + $0x168] sm:$0xff]  ;;  %v2201_v26 = vld [vmem:[#allocation9 + $0x150] sm:$0xff] }
 0x191   :  { %v529_v58 = vsub.f32 1.0, %v528_v63 }
 0x193   :  { %v530_v36 = vmul.f32 %v1440_v29, %v529_v58 }
 0x194   :  { %v1442_v17 = vpop.eup %1441 }
 0x195   :  { %v548_v52 = vmul.f32 %v1442_v17, %v546_v37  ;;  %v531_v20 = vadd.f32 %v1440_v29, %v530_v36  ;;  %vm553_vm2 = vweird.f32 %v1442_v17 }
 0x196   :  { %vm554_vm5 = vmor %vm552_vm3, %vm553_vm2 }
 0x197   :  { %v549_v21 = vsub.f32 1.0, %v548_v52  ;;  %v535_v63 = vsel %vm534_vm0, %v1440_v29, %v531_v20  ;;  %v1403_v29 = vsel %vm1322_vm4, 1.0, %v2617_v33 }
 0x198   :  { %v540_v58 = vsel %vm537_vm1, %v539_v40, %v535_v63  ;;  %1328 = vperm.xlu1 %1423, %v1403_v29   ;;  %v2624_v29 = vld [vmem:[#allocation19_spill] sm:$0xff] }
 0x199   :  { %v550_v54 = vmul.f32 %v1442_v17, %v549_v21  ;;  %v562_v42 = vmul.f32 %v540_v58, %v520_v53 }
 0x19b   :  { %v551_v30 = vadd.f32 %v1442_v17, %v550_v54  ;;  %v563_v36 = vadd.f32 %v562_v42, %v232_v7  ;;  %v579_v54 = vpop.permute.xlu0 %578 }
 0x19d   :  { %v555_v52 = vsel %vm554_vm5, %v1442_v17, %v551_v30  ;;  %1443 = vtanh.f32 %v563_v36 }
 0x19e   :  { %v560_v15 = vsel %vm557_vm6, %v559_v18, %v555_v52 }
 0x19f   :  { %v565_v21 = vsub.f32 1.0, %v560_v15  ;;  %v567_v53 = vmul.f32 %v560_v15, %v2100_v48  ;;  %v235_v15 = vadd.f32 %v2624_v29, %v2097_v49  ;;  %v2365_v29 = vld [vmem:[#allocation9 + $0x58] sm:$0xff] }
 0x1a3   :  { %v1444_v61 = vpop.eup %1443 }
 0x1a4   :  { %v566_v39 = vmul.f32 %v1444_v61, %v565_v21 }
 0x1a6   :  { %v568_v20 = vadd.f32 %v567_v53, %v566_v39 }
 0x1a8   :  { %v575_v37 = vsub.f32 %v568_v20, %v2100_v48 }
 0x1aa   :  { %v581_v42 = vmul.f32 %v579_v54, %v575_v37 }
 0x1ac   :  { %v2190_v44 = vadd.f32 %v581_v42, %v2100_v48  ;;  %v2206_v48 = vld [vmem:[#allocation9 + $0x138] sm:$0xff] }
 0x1ae   :  { %603 = vmatmul.f32.vlgmr.msra.gmra.mxu0 %v2190_v44  ;;  %623 = vmatmul.f32.vlgmr.msra.gmra.mxu1 %v2190_v44 }
 0x1af   :  { %643 = vmatmul.f32.vlgmr.msra.gmra.mxu2 %v2190_v44  ;;  %877 = vmatpush.msra.mxu0 %v1730_v11  ;;  %v2211_v11 = vld [vmem:[#allocation9 + $0x120] sm:$0xff] }
 0x1b0   :  { %962 = vmatpush.msra.mxu1 %v2196_v13  ;;  %982 = vmatpush.msra.mxu2 %v1814_v43 }
 0x1b1   :  { %878 = vmatpush.msra.mxu0 %v1734_v12  ;;  %v2216_v12 = vld [vmem:[#allocation9 + $0x108] sm:$0xff] }
 0x1b2   :  { %963 = vmatpush.msra.mxu1 %v2201_v26  ;;  %983 = vmatpush.msra.mxu2 %v1822_v47 }
 0x1b3   :  { %879 = vmatpush.msra.mxu0 %v1738_v14  ;;  %v2221_v14 = vld [vmem:[#allocation9 + $0xf0] sm:$0xff] }
 0x1b4   :  { %964 = vmatpush.msra.mxu1 %v2206_v48  ;;  %984 = vmatpush.msra.mxu2 %v1835_v51 }
 0x1b5   :  { %880 = vmatpush.msra.mxu0 %v1744_v16  ;;  %v2226_v16 = vld [vmem:[#allocation9 + $0xd8] sm:$0xff] }
 0x1b6   :  { %965 = vmatpush.msra.mxu1 %v2211_v11  ;;  %985 = vmatpush.msra.mxu2 %v1843_v55 }
 0x1b7   :  { %881 = vmatpush.msra.mxu0 %v1752_v19  ;;  %v2231_v19 = vld [vmem:[#allocation9 + $0xc0] sm:$0xff] }
 0x1b8   :  { %966 = vmatpush.msra.mxu1 %v2216_v12  ;;  %986 = vmatpush.msra.mxu2 %v1851_v57 }
 0x1b9   :  { %882 = vmatpush.msra.mxu0 %v1762_v22  ;;  %v2236_v22 = vld [vmem:[#allocation9 + $0xa8] sm:$0xff] }
 0x1ba   :  { %967 = vmatpush.msra.mxu1 %v2221_v14  ;;  %987 = vmatpush.msra.mxu2 %v1860_v59 }
 0x1bb   :  { %883 = vmatpush.msra.mxu0 %v1770_v25  ;;  %v2241_v25 = vld [vmem:[#allocation9 + $0x90] sm:$0xff] }
 0x1bc   :  { %968 = vmatpush.msra.mxu1 %v2226_v16  ;;  %988 = vmatpush.msra.mxu2 %v1867_v60 }
 0x1bd   :  { %884 = vmatpush.msra.mxu0 %v1776_v28 }
 0x1be   :  { %969 = vmatpush.msra.mxu1 %v2231_v19  ;;  %989 = vmatpush.msra.mxu2 %v1875_v62 }
 0x1bf   :  { %885 = vmatpush.msra.mxu0 %v1784_v32  ;;  %v2620_v32 = vld [vmem:[#allocation17_spill] sm:$0xff] }
 0x1c0   :  { %970 = vmatpush.msra.mxu1 %v2236_v22  ;;  %990 = vmatpush.msra.mxu2 %v1883_v2 }
 0x1c1   :  { %886 = vmatpush.msra.mxu0 %v1792_v35 }
 0x1c2   :  { %971 = vmatpush.msra.mxu1 %v2241_v25  ;;  %991 = vmatpush.msra.mxu2 %v1890_v3 }
 0x1c3   :  { %887 = vmatpush.msra.mxu0 %v1800_v38 }
 0x1c4   :  { %972 = vmatpush.msra.mxu1 %v1768_v24  ;;  %992 = vmatpush.msra.mxu2 %v1897_v5  ;;  %v2618_v24 = vld [vmem:[#allocation21_spill] sm:$0xff] }
 0x1c5   :  { %888 = vmatpush.msra.mxu0 %v1806_v41  ;;  %v2622_v41 = vld [vmem:[#allocation31_spill] sm:$0xff] }
 0x1c6   :  { %973 = vmatpush.msra.mxu1 %v1774_v27  ;;  %993 = vmatpush.msra.mxu2 %v1905_v8 }
 0x1c7   :  { %889 = vmatpush.msra.mxu0 %v1819_v45  ;;  %v2623_v45 = vld [vmem:[#allocation24_spill] sm:$0xff] }
 0x1c8   :  { %974 = vmatpush.msra.mxu1 %v1782_v31  ;;  %994 = vmatpush.msra.mxu2 %v1913_v23  ;;  %v2619_v31 = vld [vmem:[#allocation30_spill] sm:$0xff] }
 0x1c9   :  { %890 = vmatpush.msra.mxu0 %v1832_v50  ;;  %v194_v35 = vadd.f32 %v2620_v32, %v2619_v31 }
 0x1ca   :  { %975 = vmatpush.msra.mxu1 %v1788_v34  ;;  %995 = vmatpush.msra.mxu2 %v2594_v0  ;;  %v2621_v34 = vld [vmem:[#allocation26_spill] sm:$0xff] }
 0x1cb   :  { %891 = vmatpush.msra.mxu0 %v2595_v1 }
 0x1cc   :  { %976 = vmatpush.msra.mxu1 %v2596_v4  ;;  %996 = vmatpush.msra.mxu2 %v2597_v6 }
 0x1cd   :  { %892 = vmatpush.msra.mxu0 %v2598_v9 }
 0x1ce   :  { %977 = vmatpush.msra.mxu1 %v2599_v10  ;;  %997 = vmatpush.msra.mxu2 %v2618_v24 }
 0x22b   :  { %v604_v27 = vpop.f32.mrf.mxu0  ;;  %v624_v28 = vpop.f32.mrf.mxu1 }
 0x22c   :  { %v605_v38 = vadd.f32 %v604_v27, %v2621_v34  ;;  %v625_v43 = vadd.f32 %v624_v28, %v2622_v41 }
 0x22e   :  { %v647_v47 = vadd.f32 %v605_v38, %v2623_v45  ;;  %v667_v50 = vadd.f32 %v625_v43, %v194_v35  ;;  %v704_v43 = vpop.permute.xlu1 %703 }
 0x230   :  { %v1386_v51 = vmul.f32 -1.442695, %v647_v47  ;;  %v1387_v55 = vmul.f32 -1.442695, %v667_v50  ;;  %v2279_v50 = vld [vmem:[#allocation9 + $0x178] sm:$0xff] }
 0x232   :  { %1445 = vpow2.f32 %v1386_v51  ;;  %v644_v46 = vpop.f32.mrf.mxu2  ;;  %v2283_v51 = vld [vmem:[#allocation9 + $0x170] sm:$0xff] }
 0x233   :  { %1447 = vpow2.f32 %v1387_v55  ;;  %v645_v30 = vadd.f32 %v644_v46, %v2094_v56  ;;  %v2286_v55 = vld [vmem:[#allocation9 + $0x160] sm:$0xff]  ;;  %v2339_v46 = vld [vmem:[#allocation9 + $0xb0] sm:$0xff] }
 0x238   :  { %v1446_v57 = vpop.eup %1445 }
 0x239   :  { %v1448_v59 = vpop.eup %1447  ;;  %v651_v60 = vadd.f32 1.0, %v1446_v57  ;;  %v2293_v57 = vld [vmem:[#allocation9 + $0x148] sm:$0xff] }
 0x23a   :  { %v671_v62 = vadd.f32 1.0, %v1448_v59  ;;  %v2297_v59 = vld [vmem:[#allocation9 + $0x140] sm:$0xff] }
 0x23b   :  { %1449 = vrcp.f32 %v651_v60  ;;  %v663_v9 = vand.u32 2147483648, %v651_v60  ;;  %v661_v40 = vand.u32 2147483647, %v651_v60  ;;  %vm657_vm8 = vweird.f32 %v651_v60 }
 0x23c   :  { %1451 = vrcp.f32 %v671_v62  ;;  %v683_v61 = vand.u32 2147483648, %v671_v62  ;;  %vm677_vm12 = vweird.f32 %v671_v62  ;;  %v681_v39 = vand.u32 2147483647, %v671_v62 }
 0x23d   :  { %v664_v58 = vor.u32 1.1754944e-38, %v663_v9  ;;  %vm662_vm10 = vcmp.eq.f32.partialorder %v661_v40, 8.507059e+37  ;;  %v2325_v9 = vld [vmem:[#allocation9 + $0xe0] sm:$0xff]  ;;  %v2335_v40 = vld [vmem:[#allocation9 + $0xb8] sm:$0xff] }
 0x23e   :  { %v684_v37 = vor.u32 1.1754944e-38, %v683_v61  ;;  %vm682_vm14 = vcmp.eq.f32.partialorder %v681_v39, 8.507059e+37  ;;  %v2375_v61 = vld [vmem:[#allocation9 + $0x30] sm:$0xff]  ;;  %v2382_v39 = vld [vmem:[#allocation9 + $0x18] sm:$0xff] }
 0x23f   :  { %2626 = vst [vmem:[#allocation16_spill] sm:$0xff] %v2382_v39 }
 0x241   :  { %v1450_v2 = vpop.eup %1449 }
 0x242   :  { %v1452_v3 = vpop.eup %1451  ;;  %v653_v5 = vmul.f32 %v1450_v2, %v651_v60  ;;  %vm658_vm7 = vweird.f32 %v1450_v2  ;;  %v2300_v60 = vld [vmem:[#allocation9 + $0x130] sm:$0xff] }
 0x243   :  { %v673_v1 = vmul.f32 %v1452_v3, %v671_v62  ;;  %vm659_vm9 = vmor %vm657_vm8, %vm658_vm7  ;;  %vm678_vm11 = vweird.f32 %v1452_v3  ;;  %v2304_v62 = vld [vmem:[#allocation9 + $0x128] sm:$0xff] }
 0x244   :  { %v654_v4 = vsub.f32 1.0, %v653_v5  ;;  %vm679_vm13 = vmor %vm677_vm12, %vm678_vm11  ;;  %v2314_v5 = vld [vmem:[#allocation9 + $0x100] sm:$0xff] }
 0x245   :  { %v674_v10 = vsub.f32 1.0, %v673_v1  ;;  %v2318_v1 = vld [vmem:[#allocation9 + $0xf8] sm:$0xff] }
 0x246   :  { %v655_v17 = vmul.f32 %v1450_v2, %v654_v4  ;;  %v2321_v4 = vld [vmem:[#allocation9 + $0xe8] sm:$0xff] }
 0x247   :  { %v675_v63 = vmul.f32 %v1452_v3, %v674_v10  ;;  %v2328_v10 = vld [vmem:[#allocation9 + $0xd0] sm:$0xff] }
 0x248   :  { %v656_v7 = vadd.f32 %v1450_v2, %v655_v17  ;;  %v2332_v17 = vld [vmem:[#allocation9 + $0xc8] sm:$0xff] }
 0x249   :  { %v676_v52 = vadd.f32 %v1452_v3, %v675_v63  ;;  %v2342_v63 = vld [vmem:[#allocation9 + $0xa0] sm:$0xff] }
 0x24a   :  { %v660_v36 = vsel %vm659_vm9, %v1450_v2, %v656_v7  ;;  %v2307_v2 = vld [vmem:[#allocation9 + $0x118] sm:$0xff] }
 0x24b   :  { %v665_v18 = vsel %vm662_vm10, %v664_v58, %v660_v36  ;;  %v680_v20 = vsel %vm679_vm13, %v1452_v3, %v676_v52  ;;  %v2311_v3 = vld [vmem:[#allocation9 + $0x110] sm:$0xff]  ;;  %v2346_v7 = vld [vmem:[#allocation9 + $0x98] sm:$0xff]  ;;  %v2349_v58 = vld [vmem:[#allocation9 + $0x88] sm:$0xff] }
 0x24c   :  { %v687_v21 = vmul.f32 %v665_v18, %v645_v30  ;;  %v685_v54 = vsel %vm682_vm14, %v684_v37, %v680_v20  ;;  %v2352_v30 = vld [vmem:[#allocation9 + $0x78] sm:$0xff]  ;;  %v2355_v36 = vld [vmem:[#allocation9 + $0x80] sm:$0xff]  ;;  %v2358_v18 = vld [vmem:[#allocation9 + $0x70] sm:$0xff] }
 0x24d   :  { %v690_v42 = vsub.f32 1.0, %v685_v54  ;;  %v692_v32 = vmul.f32 %v685_v54, %v2190_v44  ;;  %v2361_v52 = vld [vmem:[#allocation9 + $0x60] sm:$0xff]  ;;  %v2629_v20 = vld [vmem:[#allocation20_spill] sm:$0xff] }
 0x24e   :  { %v688_v53 = vadd.f32 %v687_v21, %v235_v15  ;;  %v2368_v15 = vld [vmem:[#allocation9 + $0x48] sm:$0xff]  ;;  %v2372_v21 = vld [vmem:[#allocation9 + $0x40] sm:$0xff]  ;;  %v197_v37 = vadd.f32 %v2629_v20, %v2619_v31 }
 0x250   :  { %1453 = vtanh.f32 %v688_v53  ;;  %v2389_v53 = vld [vmem:[#allocation9] sm:$0xff] }
 0x251   :  { %2628 = vst [vmem:[#allocation17_spill] sm:$0xff] %v2389_v53 }
 0x256   :  { %v1454_v27 = vpop.eup %1453 }
 0x257   :  { %v691_v28 = vmul.f32 %v1454_v27, %v690_v42 }
 0x259   :  { %v693_v35 = vadd.f32 %v692_v32, %v691_v28  ;;  %v2630_v32 = vld [vmem:[#allocation25_spill] sm:$0xff] }
 0x25b   :  { %v700_v38 = vsub.f32 %v693_v35, %v2190_v44 }
 0x25d   :  { %v706_v45 = vmul.f32 %v704_v43, %v700_v38 }
 0x25f   :  { %v2274_v47 = vadd.f32 %v706_v45, %v2190_v44  ;;  %v2290_v44 = vld [vmem:[#allocation9 + $0x158] sm:$0xff] }
 0x261   :  { %728 = vmatmul.f32.vlgmr.msrb.gmra.mxu3 %v2274_v47  ;;  %748 = vmatmul.f32.vlgmr.msrb.gmra.mxu0 %v2274_v47 }
 0x262   :  { %768 = vmatmul.f32.vlgmr.msrb.gmra.mxu1 %v2274_v47  ;;  %1002 = vmatpush.msrb.mxu3 %v2279_v50 }
 0x263   :  { %1087 = vmatpush.msrb.mxu0 %v2196_v13  ;;  %1107 = vmatpush.msrb.mxu1 %v2283_v51 }
 0x264   :  { %1003 = vmatpush.msrb.mxu3 %v2286_v55 }
 0x265   :  { %1088 = vmatpush.msrb.mxu0 %v2201_v26  ;;  %1108 = vmatpush.msrb.mxu1 %v2290_v44 }
 0x266   :  { %1004 = vmatpush.msrb.mxu3 %v2293_v57 }
 0x267   :  { %1089 = vmatpush.msrb.mxu0 %v2206_v48  ;;  %1109 = vmatpush.msrb.mxu1 %v2297_v59 }
 0x268   :  { %1005 = vmatpush.msrb.mxu3 %v2300_v60 }
 0x269   :  { %1090 = vmatpush.msrb.mxu0 %v2211_v11  ;;  %1110 = vmatpush.msrb.mxu1 %v2304_v62 }
 0x26a   :  { %1006 = vmatpush.msrb.mxu3 %v2307_v2 }
 0x26b   :  { %1091 = vmatpush.msrb.mxu0 %v2216_v12  ;;  %1111 = vmatpush.msrb.mxu1 %v2311_v3 }
 0x26c   :  { %1007 = vmatpush.msrb.mxu3 %v2314_v5 }
 0x26d   :  { %1092 = vmatpush.msrb.mxu0 %v2221_v14  ;;  %1112 = vmatpush.msrb.mxu1 %v2318_v1 }
 0x26e   :  { %1008 = vmatpush.msrb.mxu3 %v2321_v4 }
 0x26f   :  { %1093 = vmatpush.msrb.mxu0 %v2226_v16  ;;  %1113 = vmatpush.msrb.mxu1 %v2325_v9 }
 0x270   :  { %1009 = vmatpush.msrb.mxu3 %v2328_v10 }
 0x271   :  { %1094 = vmatpush.msrb.mxu0 %v2231_v19  ;;  %1114 = vmatpush.msrb.mxu1 %v2332_v17 }
 0x272   :  { %1010 = vmatpush.msrb.mxu3 %v2335_v40 }
 0x273   :  { %1095 = vmatpush.msrb.mxu0 %v2236_v22  ;;  %1115 = vmatpush.msrb.mxu1 %v2339_v46 }
 0x274   :  { %1011 = vmatpush.msrb.mxu3 %v2342_v63 }
 0x275   :  { %1096 = vmatpush.msrb.mxu0 %v2241_v25  ;;  %1116 = vmatpush.msrb.mxu1 %v2346_v7 }
 0x276   :  { %1012 = vmatpush.msrb.mxu3 %v2349_v58 }
 0x277   :  { %1097 = vmatpush.msrb.mxu0 %v2352_v30  ;;  %1117 = vmatpush.msrb.mxu1 %v2355_v36 }
 0x278   :  { %1013 = vmatpush.msrb.mxu3 %v2358_v18 }
 0x279   :  { %1098 = vmatpush.msrb.mxu0 %v2361_v52  ;;  %1118 = vmatpush.msrb.mxu1 %v1905_v8  ;;  %v2379_v8 = vld [vmem:[#allocation9 + $0x28] sm:$0xff] }
 0x27a   :  { %1014 = vmatpush.msrb.mxu3 %v2365_v29  ;;  %2625 = vst [vmem:[#allocation22_spill] sm:$0xff] %v2379_v8 }
 0x27b   :  { %1099 = vmatpush.msrb.mxu0 %v2368_v15  ;;  %1119 = vmatpush.msrb.mxu1 %v1913_v23  ;;  %v2386_v23 = vld [vmem:[#allocation9 + $0x10] sm:$0xff] }
 0x27c   :  { %1015 = vmatpush.msrb.mxu3 %v2372_v21  ;;  %2627 = vst [vmem:[#allocation21_spill] sm:$0xff] %v2386_v23 }
 0x27d   :  { %1100 = vmatpush.msrb.mxu0 %v2375_v61  ;;  %1120 = vmatpush.msrb.mxu1 %v2594_v0 }
 0x27e   :  { %1016 = vmatpush.msrb.mxu3 %v2379_v8 }
 0x27f   :  { %1101 = vmatpush.msrb.mxu0 %v2382_v39  ;;  %1121 = vmatpush.msrb.mxu1 %v2597_v6 }
 0x280   :  { %1017 = vmatpush.msrb.mxu3 %v2386_v23 }
 0x281   :  { %1102 = vmatpush.msrb.mxu0 %v2389_v53  ;;  %1122 = vmatpush.msrb.mxu1 %v2618_v24 }
 0x2de   :  { %v749_v0 = vpop.f32.mrf.mxu0 }
 0x2df   :  { %v750_v54 = vadd.f32 %v749_v0, %v2622_v41 }
 0x2e1   :  { %v792_v42 = vadd.f32 %v750_v54, %v197_v37  ;;  %v1548_v37 = vld [vmem:[%s2535_s0] sm:$0xff]  ;;  %s1665_s0 = smov [#allocation10]  }
 0x2e2   :  { %vm947_vm15 = vcmp.gt.f32.partialorder %v1548_v37, 4.0  ;;  %vm1072_vm1 = vcmp.gt.f32.partialorder %v1548_v37, 5.0  ;;  %s1343_s19 = sshll.u32 %s1665_s0, 4  ;;  %s1344_s19 = int_to_ptr.vmem [resolvable:$true] %s1343_s19 }
 0x2e3   :  { %v1390_v27 = vmul.f32 -1.442695, %v792_v42  ;;  %v1394_v42 = vsel %vm947_vm15, 1.0, %v2617_v33  ;;  %v1397_v41 = vsel %vm1072_vm1, 1.0, %v2617_v33 }
 0x2e4   :  { %v729_v28 = vpop.f32.mrf.mxu3  ;;  %953 = vperm.xlu2 %1424, %v1394_v42   ;;  %v2631_v42 = vld [vmem:[#allocation14_spill] sm:$0xff] }
 0x2e5   :  { %1455 = vpow2.f32 %v1390_v27  ;;  %v730_v6 = vadd.f32 %v729_v28, %v2621_v34 }
 0x2e7   :  { %v772_v35 = vadd.f32 %v730_v6, %v2630_v32 }
 0x2e9   :  { %v1389_v38 = vmul.f32 -1.442695, %v772_v35 }
 0x2eb   :  { %v1456_v43 = vpop.eup %1455  ;;  %1457 = vpow2.f32 %v1389_v38  ;;  %v769_v38 = vpop.f32.mrf.mxu1 }
 0x2ec   :  { %v796_v45 = vadd.f32 1.0, %v1456_v43  ;;  %v770_v34 = vadd.f32 %v769_v38, %v2094_v56  ;;  %1078 = vperm.xlu2 %1424, %v1397_v41  }
 0x2ee   :  { %1459 = vrcp.f32 %v796_v45  ;;  %v808_v8 = vand.u32 2147483648, %v796_v45  ;;  %vm802_vm6 = vweird.f32 %v796_v45 }
 0x2f1   :  { %v1458_v24 = vpop.eup %1457 }
 0x2f2   :  { %v776_v53 = vadd.f32 1.0, %v1458_v24 }
 0x2f4   :  { %1461 = vrcp.f32 %v776_v53  ;;  %v1460_v23 = vpop.eup %1459  ;;  %v788_v28 = vand.u32 2147483648, %v776_v53  ;;  %v786_v32 = vand.u32 2147483647, %v776_v53  ;;  %vm782_vm2 = vweird.f32 %v776_v53 }
 0x2f5   :  { %v798_v20 = vmul.f32 %v1460_v23, %v796_v45  ;;  %vm803_vm5 = vweird.f32 %v1460_v23 }
 0x2f6   :  { %v789_v24 = vor.u32 1.1754944e-38, %v788_v28  ;;  %vm787_vm4 = vcmp.eq.f32.partialorder %v786_v32, 8.507059e+37  ;;  %vm804_vm7 = vmor %vm802_vm6, %vm803_vm5 }
 0x2f7   :  { %v799_v54 = vsub.f32 1.0, %v798_v20 }
 0x2f9   :  { %v800_v35 = vmul.f32 %v1460_v23, %v799_v54  ;;  %v806_v54 = vand.u32 2147483647, %v796_v45 }
 0x2fa   :  { %v1462_v31 = vpop.eup %1461 }
 0x2fb   :  { %v778_v0 = vmul.f32 %v1462_v31, %v776_v53  ;;  %vm783_vm0 = vweird.f32 %v1462_v31  ;;  %v801_v39 = vadd.f32 %v1460_v23, %v800_v35  ;;  %vm807_vm8 = vcmp.eq.f32.partialorder %v806_v54, 8.507059e+37 }
 0x2fc   :  { %vm784_vm3 = vmor %vm782_vm2, %vm783_vm0 }
 0x2fd   :  { %v779_v27 = vsub.f32 1.0, %v778_v0  ;;  %v805_v28 = vsel %vm804_vm7, %v1460_v23, %v801_v39 }
 0x2ff   :  { %v780_v6 = vmul.f32 %v1462_v31, %v779_v27  ;;  %v238_v27 = vadd.f32 %v2631_v42, %v2097_v49 }
 0x301   :  { %v781_v43 = vadd.f32 %v1462_v31, %v780_v6  ;;  %v809_v6 = vor.u32 1.1754944e-38, %v808_v8 }
 0x303   :  { %v785_v20 = vsel %vm784_vm3, %v1462_v31, %v781_v43  ;;  %v810_v33 = vsel %vm807_vm8, %v809_v6, %v805_v28 }
 0x304   :  { %v790_v0 = vsel %vm787_vm4, %v789_v24, %v785_v20  ;;  %v815_v31 = vsub.f32 1.0, %v810_v33  ;;  %v817_v35 = vmul.f32 %v810_v33, %v2274_v47  ;;  %v829_v20 = vpop.permute.xlu1 %828 }
 0x305   :  { %v812_v37 = vmul.f32 %v790_v0, %v770_v34 }
 0x307   :  { %v813_v53 = vadd.f32 %v812_v37, %v238_v27 }
 0x309   :  { %1463 = vtanh.f32 %v813_v53 }
 0x30f   :  { %v1464_v32 = vpop.eup %1463 }
 0x310   :  { %v816_v38 = vmul.f32 %v1464_v32, %v815_v31 }
 0x312   :  { %v818_v43 = vadd.f32 %v817_v35, %v816_v38 }
 0x314   :  { %v825_v24 = vsub.f32 %v818_v43, %v2274_v47 }
 0x316   :  { %v831_v34 = vmul.f32 %v829_v20, %v825_v24  ;;  %v2641_v24 = vld [vmem:[#allocation18_spill] sm:$0xff] }
 0x317   :  { %v241_v20 = vadd.f32 %v2641_v24, %v2097_v49 }
 0x318   :  { %v2409_v41 = vadd.f32 %v831_v34, %v2274_v47 }
 0x31a   :  { %853 = vmatmul.f32.vlgmr.msrb.gmra.mxu2 %v2409_v41  ;;  %873 = vmatmul.f32.vlgmr.msra.gmra.mxu3 %v2409_v41 }
 0x31b   :  { %893 = vmatmul.f32.vlgmr.msra.gmra.mxu0 %v2409_v41  ;;  %1127 = vmatpush.msrb.mxu2 %v2279_v50 }
 0x31c   :  { %1212 = vmatpush.msra.mxu3 %v2196_v13  ;;  %1232 = vmatpush.msra.mxu0 %v2283_v51  ;;  %v1549_v13 = vld [vmem:[#allocation9 + $0x68] sm:$0xff] }
 0x31d   :  { %1128 = vmatpush.msrb.mxu2 %v2286_v55  ;;  %v2636_v51 = vld [vmem:[#allocation30_spill] sm:$0xff] }
 0x31e   :  { %1213 = vmatpush.msra.mxu3 %v2201_v26  ;;  %1233 = vmatpush.msra.mxu0 %v2290_v44  ;;  %v1550_v26 = vld [vmem:[#allocation9 + $0x50] sm:$0xff] }
 0x31f   :  { %1129 = vmatpush.msrb.mxu2 %v2293_v57  ;;  %v2637_v44 = vld [vmem:[#allocation15_spill] sm:$0xff] }
 0x320   :  { %1214 = vmatpush.msra.mxu3 %v2206_v48  ;;  %1234 = vmatpush.msra.mxu0 %v2297_v59  ;;  %v1551_v48 = vld [vmem:[#allocation9 + $0x38] sm:$0xff]  ;;  %v200_v59 = vadd.f32 %v2637_v44, %v2636_v51 }
 0x321   :  { %1130 = vmatpush.msrb.mxu2 %v2300_v60 }
 0x322   :  { %1215 = vmatpush.msra.mxu3 %v2211_v11  ;;  %1235 = vmatpush.msra.mxu0 %v2304_v62  ;;  %v2632_v11 = vld [vmem:[#allocation22_spill] sm:$0xff] }
 0x323   :  { %1131 = vmatpush.msrb.mxu2 %v2307_v2  ;;  %v2638_v62 = vld [vmem:[#allocation26_spill] sm:$0xff] }
 0x324   :  { %1216 = vmatpush.msra.mxu3 %v2216_v12  ;;  %1236 = vmatpush.msra.mxu0 %v2311_v3  ;;  %v2633_v12 = vld [vmem:[#allocation16_spill] sm:$0xff] }
 0x325   :  { %1132 = vmatpush.msrb.mxu2 %v2314_v5 }
 0x326   :  { %1217 = vmatpush.msra.mxu3 %v2221_v14  ;;  %1237 = vmatpush.msra.mxu0 %v2318_v1  ;;  %v1552_v14 = vld [vmem:[#allocation9 + $0x20] sm:$0xff]  ;;  %v2639_v1 = vld [vmem:[#allocation31_spill] sm:$0xff] }
 0x327   :  { %1133 = vmatpush.msrb.mxu2 %v2321_v4 }
 0x328   :  { %1218 = vmatpush.msra.mxu3 %v2226_v16  ;;  %1238 = vmatpush.msra.mxu0 %v2325_v9  ;;  %v2634_v16 = vld [vmem:[#allocation21_spill] sm:$0xff] }
 0x329   :  { %1134 = vmatpush.msrb.mxu2 %v2328_v10 }
 0x32a   :  { %1219 = vmatpush.msra.mxu3 %v2231_v19  ;;  %1239 = vmatpush.msra.mxu0 %v2332_v17  ;;  %v2635_v19 = vld [vmem:[#allocation17_spill] sm:$0xff]  ;;  %v2640_v17 = vld [vmem:[#allocation27_spill] sm:$0xff] }
 0x32b   :  { %1135 = vmatpush.msrb.mxu2 %v2335_v40 }
 0x32c   :  { %1220 = vmatpush.msra.mxu3 %v2236_v22  ;;  %1240 = vmatpush.msra.mxu0 %v2339_v46  ;;  %v1553_v22 = vld [vmem:[#allocation9 + $0x8] sm:$0xff] }
 0x32d   :  { %1136 = vmatpush.msrb.mxu2 %v2342_v63 }
 0x32e   :  { %1221 = vmatpush.msra.mxu3 %v2241_v25  ;;  %1241 = vmatpush.msra.mxu0 %v2346_v7 }
 0x32f   :  { %1137 = vmatpush.msrb.mxu2 %v2349_v58 }
 0x330   :  { %1222 = vmatpush.msra.mxu3 %v2352_v30  ;;  %1242 = vmatpush.msra.mxu0 %v2355_v36 }
 0x331   :  { %1138 = vmatpush.msrb.mxu2 %v2358_v18 }
 0x332   :  { %1223 = vmatpush.msra.mxu3 %v2361_v52  ;;  %1243 = vmatpush.msra.mxu0 %v1549_v13 }
 0x333   :  { %1139 = vmatpush.msrb.mxu2 %v2365_v29 }
 0x334   :  { %1224 = vmatpush.msra.mxu3 %v2368_v15  ;;  %1244 = vmatpush.msra.mxu0 %v1550_v26 }
 0x335   :  { %1140 = vmatpush.msrb.mxu2 %v2372_v21 }
 0x336   :  { %1225 = vmatpush.msra.mxu3 %v2375_v61  ;;  %1245 = vmatpush.msra.mxu0 %v1551_v48 }
 0x337   :  { %1141 = vmatpush.msrb.mxu2 %v2632_v11 }
 0x338   :  { %1226 = vmatpush.msra.mxu3 %v2633_v12  ;;  %1246 = vmatpush.msra.mxu0 %v1552_v14 }
 0x339   :  { %1142 = vmatpush.msrb.mxu2 %v2634_v16 }
 0x33a   :  { %1227 = vmatpush.msra.mxu3 %v2635_v19  ;;  %1247 = vmatpush.msra.mxu0 %v1553_v22 }
 0x398   :  { %v894_v28 = vpop.f32.mrf.mxu0 }
 0x399   :  { %v895_v32 = vadd.f32 %v894_v28, %v2094_v56 }
 0x39d   :  { %v854_v25 = vpop.f32.mrf.mxu2  ;;  %v874_v47 = vpop.f32.mrf.mxu3 }
 0x39e   :  { %v855_v3 = vadd.f32 %v854_v25, %v2638_v62  ;;  %v875_v9 = vadd.f32 %v874_v47, %v2639_v1 }
 0x3a0   :  { %v897_v46 = vadd.f32 %v855_v3, %v2640_v17  ;;  %v917_v7 = vadd.f32 %v875_v9, %v200_v59  ;;  %v954_v9 = vpop.permute.xlu2 %953 }
 0x3a2   :  { %v1392_v30 = vmul.f32 -1.442695, %v897_v46  ;;  %v1393_v36 = vmul.f32 -1.442695, %v917_v7 }
 0x3a4   :  { %1465 = vpow2.f32 %v1392_v30 }
 0x3a5   :  { %1467 = vpow2.f32 %v1393_v36 }
 0x3aa   :  { %v1466_v52 = vpop.eup %1465 }
 0x3ab   :  { %v1468_v15 = vpop.eup %1467  ;;  %v901_v61 = vadd.f32 1.0, %v1466_v52 }
 0x3ac   :  { %v921_v8 = vadd.f32 1.0, %v1468_v15 }
 0x3ad   :  { %1469 = vrcp.f32 %v901_v61  ;;  %v913_v27 = vand.u32 2147483648, %v901_v61  ;;  %v911_v53 = vand.u32 2147483647, %v901_v61  ;;  %vm907_vm10 = vweird.f32 %v901_v61 }
 0x3ae   :  { %1471 = vrcp.f32 %v921_v8  ;;  %v933_v34 = vand.u32 2147483648, %v921_v8  ;;  %vm927_vm14 = vweird.f32 %v921_v8  ;;  %v931_v26 = vand.u32 2147483647, %v921_v8 }
 0x3af   :  { %v914_v31 = vor.u32 1.1754944e-38, %v913_v27  ;;  %vm912_vm12 = vcmp.eq.f32.partialorder %v911_v53, 8.507059e+37  ;;  %v2644_v27 = vld [vmem:[#allocation33_spill] sm:$0xff] }
 0x3b0   :  { %v934_v14 = vor.u32 1.1754944e-38, %v933_v34  ;;  %vm932_vm0 = vcmp.eq.f32.partialorder %v931_v26, 8.507059e+37 }
 0x3b3   :  { %v1470_v39 = vpop.eup %1469 }
 0x3b4   :  { %v1472_v23 = vpop.eup %1471  ;;  %v903_v45 = vmul.f32 %v1470_v39, %v901_v61  ;;  %vm908_vm9 = vweird.f32 %v1470_v39 }
 0x3b5   :  { %v923_v0 = vmul.f32 %v1472_v23, %v921_v8  ;;  %vm909_vm11 = vmor %vm907_vm10, %vm908_vm9  ;;  %vm928_vm13 = vweird.f32 %v1472_v23 }
 0x3b6   :  { %v904_v42 = vsub.f32 1.0, %v903_v45  ;;  %vm929_vm15 = vmor %vm927_vm14, %vm928_vm13 }
 0x3b7   :  { %v924_v37 = vsub.f32 1.0, %v923_v0 }
 0x3b8   :  { %v905_v54 = vmul.f32 %v1470_v39, %v904_v42 }
 0x3b9   :  { %v925_v6 = vmul.f32 %v1472_v23, %v924_v37  ;;  %v244_v37 = vadd.f32 %v2644_v27, %v2097_v49 }
 0x3ba   :  { %v906_v33 = vadd.f32 %v1470_v39, %v905_v54 }
 0x3bb   :  { %v926_v43 = vadd.f32 %v1472_v23, %v925_v6 }
 0x3bc   :  { %v910_v35 = vsel %vm909_vm11, %v1470_v39, %v906_v33 }
 0x3bd   :  { %v915_v38 = vsel %vm912_vm12, %v914_v31, %v910_v35  ;;  %v930_v12 = vsel %vm929_vm15, %v1472_v23, %v926_v43 }
 0x3be   :  { %v937_v13 = vmul.f32 %v915_v38, %v895_v32  ;;  %v935_v19 = vsel %vm932_vm0, %v934_v14, %v930_v12  ;;  %v1079_v12 = vpop.permute.xlu2 %1078 }
 0x3bf   :  { %v940_v22 = vsub.f32 1.0, %v935_v19  ;;  %v942_v44 = vmul.f32 %v935_v19, %v2409_v41 }
 0x3c0   :  { %v938_v48 = vadd.f32 %v937_v13, %v241_v20 }
 0x3c2   :  { %1473 = vtanh.f32 %v938_v48 }
 0x3c8   :  { %v1474_v25 = vpop.eup %1473 }
 0x3c9   :  { %v941_v47 = vmul.f32 %v1474_v25, %v940_v22 }
 0x3cb   :  { %v943_v59 = vadd.f32 %v942_v44, %v941_v47  ;;  %v2645_v47 = vld [vmem:[#allocation36_spill] sm:$0xff] }
 0x3cc   :  { %v206_v44 = vadd.f32 %v2645_v47, %v2636_v51 }
 0x3cd   :  { %v950_v3 = vsub.f32 %v943_v59, %v2409_v41 }
 0x3cf   :  { %v956_v17 = vmul.f32 %v954_v9, %v950_v3  ;;  %v2646_v9 = vld [vmem:[#allocation29_spill] sm:$0xff] }
 0x3d1   :  { %v2468_v46 = vadd.f32 %v956_v17, %v2409_v41 }
 0x3d3   :  { %978 = vmatmul.f32.vlgmr.msra.gmra.mxu1 %v2468_v46  ;;  %998 = vmatmul.f32.vlgmr.msra.gmra.mxu2 %v2468_v46 }
 0x3d4   :  { %1018 = vmatmul.f32.vlgmr.msrb.gmra.mxu3 %v2468_v46  ;;  %1252 = vmatpush.msra.mxu1 %v2279_v50 }
 0x3d6   :  { %1253 = vmatpush.msra.mxu1 %v2286_v55 }
 0x3d8   :  { %1254 = vmatpush.msra.mxu1 %v2293_v57  ;;  %v2642_v57 = vld [vmem:[#allocation28_spill] sm:$0xff] }
 0x3da   :  { %1255 = vmatpush.msra.mxu1 %v2300_v60 }
 0x3dc   :  { %1256 = vmatpush.msra.mxu1 %v2307_v2 }
 0x3de   :  { %1257 = vmatpush.msra.mxu1 %v2314_v5 }
 0x3e0   :  { %1258 = vmatpush.msra.mxu1 %v2321_v4  ;;  %v2643_v4 = vld [vmem:[#allocation34_spill] sm:$0xff] }
 0x3e2   :  { %1259 = vmatpush.msra.mxu1 %v2328_v10  ;;  %v203_v10 = vadd.f32 %v2643_v4, %v2636_v51 }
 0x3e4   :  { %1260 = vmatpush.msra.mxu1 %v2335_v40 }
 0x3e6   :  { %1261 = vmatpush.msra.mxu1 %v2342_v63 }
 0x3e8   :  { %1262 = vmatpush.msra.mxu1 %v2349_v58 }
 0x3ea   :  { %1263 = vmatpush.msra.mxu1 %v2358_v18 }
 0x3ec   :  { %1264 = vmatpush.msra.mxu1 %v2365_v29 }
 0x3ee   :  { %1265 = vmatpush.msra.mxu1 %v2372_v21 }
 0x3f0   :  { %1266 = vmatpush.msra.mxu1 %v2632_v11 }
 0x3f2   :  { %1267 = vmatpush.msra.mxu1 %v2634_v16 }
 0x450   :  { %v979_v50 = vpop.f32.mrf.mxu1 }
 0x451   :  { %v980_v55 = vadd.f32 %v979_v50, %v2638_v62 }
 0x453   :  { %v1022_v60 = vadd.f32 %v980_v55, %v2642_v57 }
 0x455   :  { %v1395_v2 = vmul.f32 -1.442695, %v1022_v60 }
 0x456   :  { %v999_v5 = vpop.f32.mrf.mxu2 }
 0x457   :  { %1475 = vpow2.f32 %v1395_v2  ;;  %v1000_v40 = vadd.f32 %v999_v5, %v2639_v1  ;;  %v1019_v61 = vpop.f32.mrf.mxu3 }
 0x458   :  { %v1020_v0 = vadd.f32 %v1019_v61, %v2094_v56 }
 0x459   :  { %v1042_v63 = vadd.f32 %v1000_v40, %v203_v10 }
 0x45b   :  { %v1396_v58 = vmul.f32 -1.442695, %v1042_v63 }
 0x45d   :  { %v1476_v18 = vpop.eup %1475  ;;  %1477 = vpow2.f32 %v1396_v58 }
 0x45e   :  { %v1026_v29 = vadd.f32 1.0, %v1476_v18 }
 0x460   :  { %1479 = vrcp.f32 %v1026_v29  ;;  %v1038_v30 = vand.u32 2147483648, %v1026_v29  ;;  %v1036_v52 = vand.u32 2147483647, %v1026_v29  ;;  %vm1032_vm2 = vweird.f32 %v1026_v29 }
 0x462   :  { %v1039_v23 = vor.u32 1.1754944e-38, %v1038_v30  ;;  %vm1037_vm4 = vcmp.eq.f32.partialorder %v1036_v52, 8.507059e+37 }
 0x463   :  { %v1478_v21 = vpop.eup %1477 }
 0x464   :  { %v1046_v41 = vadd.f32 1.0, %v1478_v21 }
 0x466   :  { %v1480_v11 = vpop.eup %1479  ;;  %1481 = vrcp.f32 %v1046_v41  ;;  %v1058_v28 = vand.u32 2147483648, %v1046_v41  ;;  %v1056_v33 = vand.u32 2147483647, %v1046_v41  ;;  %vm1052_vm6 = vweird.f32 %v1046_v41 }
 0x467   :  { %v1028_v16 = vmul.f32 %v1480_v11, %v1026_v29  ;;  %vm1033_vm1 = vweird.f32 %v1480_v11 }
 0x468   :  { %vm1034_vm3 = vmor %vm1032_vm2, %vm1033_vm1  ;;  %v1059_v35 = vor.u32 1.1754944e-38, %v1058_v28  ;;  %vm1057_vm8 = vcmp.eq.f32.partialorder %v1056_v33, 8.507059e+37 }
 0x469   :  { %v1029_v7 = vsub.f32 1.0, %v1028_v16 }
 0x46b   :  { %v1030_v36 = vmul.f32 %v1480_v11, %v1029_v7 }
 0x46c   :  { %v1482_v15 = vpop.eup %1481 }
 0x46d   :  { %v1048_v8 = vmul.f32 %v1482_v15, %v1046_v41  ;;  %v1031_v39 = vadd.f32 %v1480_v11, %v1030_v36  ;;  %vm1053_vm5 = vweird.f32 %v1482_v15 }
 0x46e   :  { %vm1054_vm7 = vmor %vm1052_vm6, %vm1053_vm5 }
 0x46f   :  { %v1049_v45 = vsub.f32 1.0, %v1048_v8  ;;  %v1035_v42 = vsel %vm1034_vm3, %v1480_v11, %v1031_v39  ;;  %v2647_v8 = vld [vmem:[#allocation35_spill] sm:$0xff] }
 0x470   :  { %v1040_v54 = vsel %vm1037_vm4, %v1039_v23, %v1035_v42  ;;  %v247_v39 = vadd.f32 %v2647_v8, %v2097_v49 }
 0x471   :  { %v1050_v53 = vmul.f32 %v1482_v15, %v1049_v45  ;;  %v1062_v6 = vmul.f32 %v1040_v54, %v1020_v0 }
 0x473   :  { %v1051_v31 = vadd.f32 %v1482_v15, %v1050_v53  ;;  %v1063_v32 = vadd.f32 %v1062_v6, %v244_v37 }
 0x475   :  { %v1055_v38 = vsel %vm1054_vm7, %v1482_v15, %v1051_v31  ;;  %1483 = vtanh.f32 %v1063_v32 }
 0x476   :  { %v1060_v43 = vsel %vm1057_vm8, %v1059_v35, %v1055_v38  ;;  %v1204_v35 = vpop.permute.xlu0 %1203 }
 0x477   :  { %v1065_v24 = vsub.f32 1.0, %v1060_v43  ;;  %v1067_v13 = vmul.f32 %v1060_v43, %v2468_v46 }
 0x47b   :  { %v1484_v20 = vpop.eup %1483 }
 0x47c   :  { %v1066_v34 = vmul.f32 %v1484_v20, %v1065_v24  ;;  %v2648_v20 = vld [vmem:[#allocation32_spill] sm:$0xff] }
 0x47e   :  { %v1068_v26 = vadd.f32 %v1067_v13, %v1066_v34  ;;  %v209_v34 = vadd.f32 %v2648_v20, %v2636_v51 }
 0x480   :  { %v1075_v48 = vsub.f32 %v1068_v26, %v2468_v46 }
 0x482   :  { %v1081_v14 = vmul.f32 %v1079_v12, %v1075_v48 }
 0x484   :  { %v2500_v19 = vadd.f32 %v1081_v14, %v2468_v46 }
 0x486   :  { %1103 = vmatmul.f32.vlgmr.msrb.gmra.mxu0 %v2500_v19  ;;  %1123 = vmatmul.f32.vlgmr.msrb.gmra.mxu1 %v2500_v19 }
 0x487   :  { %1143 = vmatmul.f32.vlgmr.msrb.gmra.mxu2 %v2500_v19 }
 0x503   :  { %v1104_v22 = vpop.f32.mrf.mxu0  ;;  %v1124_v25 = vpop.f32.mrf.mxu1 }
 0x504   :  { %v1105_v59 = vadd.f32 %v1104_v22, %v2638_v62  ;;  %v1125_v3 = vadd.f32 %v1124_v25, %v2639_v1 }
 0x506   :  { %v1147_v17 = vadd.f32 %v1105_v59, %v2646_v9  ;;  %v1167_v50 = vadd.f32 %v1125_v3, %v206_v44 }
 0x508   :  { %v1398_v46 = vmul.f32 -1.442695, %v1147_v17  ;;  %v1399_v55 = vmul.f32 -1.442695, %v1167_v50 }
 0x50a   :  { %1485 = vpow2.f32 %v1398_v46  ;;  %v1144_v16 = vpop.f32.mrf.mxu2 }
 0x50b   :  { %1487 = vpow2.f32 %v1399_v55  ;;  %v1145_v36 = vadd.f32 %v1144_v16, %v2094_v56 }
 0x510   :  { %v1486_v57 = vpop.eup %1485 }
 0x511   :  { %v1488_v60 = vpop.eup %1487  ;;  %v1151_v2 = vadd.f32 1.0, %v1486_v57 }
 0x512   :  { %v1171_v5 = vadd.f32 1.0, %v1488_v60 }
 0x513   :  { %1489 = vrcp.f32 %v1151_v2  ;;  %v1163_v29 = vand.u32 2147483648, %v1151_v2  ;;  %v1161_v41 = vand.u32 2147483647, %v1151_v2  ;;  %vm1157_vm10 = vweird.f32 %v1151_v2 }
 0x514   :  { %1491 = vrcp.f32 %v1171_v5  ;;  %v1183_v23 = vand.u32 2147483648, %v1171_v5  ;;  %vm1177_vm14 = vweird.f32 %v1171_v5  ;;  %v1181_v0 = vand.u32 2147483647, %v1171_v5 }
 0x515   :  { %v1164_v30 = vor.u32 1.1754944e-38, %v1163_v29  ;;  %vm1162_vm12 = vcmp.eq.f32.partialorder %v1161_v41, 8.507059e+37 }
 0x516   :  { %v1184_v37 = vor.u32 1.1754944e-38, %v1183_v23  ;;  %vm1182_vm0 = vcmp.eq.f32.partialorder %v1181_v0, 8.507059e+37 }
 0x519   :  { %v1490_v4 = vpop.eup %1489 }
 0x51a   :  { %v1492_v10 = vpop.eup %1491  ;;  %v1153_v40 = vmul.f32 %v1490_v4, %v1151_v2  ;;  %vm1158_vm9 = vweird.f32 %v1490_v4 }
 0x51b   :  { %v1173_v63 = vmul.f32 %v1492_v10, %v1171_v5  ;;  %vm1159_vm11 = vmor %vm1157_vm10, %vm1158_vm9  ;;  %vm1178_vm13 = vweird.f32 %v1492_v10 }
 0x51c   :  { %v1154_v58 = vsub.f32 1.0, %v1153_v40  ;;  %vm1179_vm15 = vmor %vm1177_vm14, %vm1178_vm13 }
 0x51d   :  { %v1174_v18 = vsub.f32 1.0, %v1173_v63 }
 0x51e   :  { %v1155_v21 = vmul.f32 %v1490_v4, %v1154_v58 }
 0x51f   :  { %v1175_v11 = vmul.f32 %v1492_v10, %v1174_v18  ;;  %v2650_v18 = vld [vmem:[#allocation37_spill] sm:$0xff] }
 0x520   :  { %v1156_v7 = vadd.f32 %v1490_v4, %v1155_v21  ;;  %v250_v29 = vadd.f32 %v2650_v18, %v2097_v49  ;;  %v1329_v49 = vpop.permute.xlu1 %1328 }
 0x521   :  { %v1176_v61 = vadd.f32 %v1492_v10, %v1175_v11 }
 0x522   :  { %v1160_v52 = vsel %vm1159_vm11, %v1490_v4, %v1156_v7 }
 0x523   :  { %v1165_v15 = vsel %vm1162_vm12, %v1164_v30, %v1160_v52  ;;  %v1180_v27 = vsel %vm1179_vm15, %v1492_v10, %v1176_v61 }
 0x524   :  { %v1187_v45 = vmul.f32 %v1165_v15, %v1145_v36  ;;  %v1185_v54 = vsel %vm1182_vm0, %v1184_v37, %v1180_v27 }
 0x525   :  { %v1190_v53 = vsub.f32 1.0, %v1185_v54  ;;  %v1192_v33 = vmul.f32 %v1185_v54, %v2500_v19 }
 0x526   :  { %v1188_v42 = vadd.f32 %v1187_v45, %v247_v39 }
 0x528   :  { %1493 = vtanh.f32 %v1188_v42 }
 0x52e   :  { %v1494_v28 = vpop.eup %1493 }
 0x52f   :  { %v1191_v6 = vmul.f32 %v1494_v28, %v1190_v53 }
 0x531   :  { %v1193_v31 = vadd.f32 %v1192_v33, %v1191_v6 }
 0x533   :  { %v1200_v32 = vsub.f32 %v1193_v31, %v2500_v19 }
 0x535   :  { %v1206_v38 = vmul.f32 %v1204_v35, %v1200_v32 }
 0x537   :  { %v2516_v43 = vadd.f32 %v1206_v38, %v2500_v19  ;;  %v2649_v19 = vld [vmem:[#allocation23_spill] sm:$0xff] }
 0x539   :  { %1228 = vmatmul.f32.vlgmr.msra.gmra.mxu3 %v2516_v43  ;;  %1248 = vmatmul.f32.vlgmr.msra.gmra.mxu0 %v2516_v43 }
 0x53a   :  { %1268 = vmatmul.f32.vlgmr.msra.gmra.mxu1 %v2516_v43 }
 0x5b6   :  { %v1249_v24 = vpop.f32.mrf.mxu0 }
 0x5b7   :  { %v1250_v13 = vadd.f32 %v1249_v24, %v2639_v1  ;;  %v1269_v2 = vpop.f32.mrf.mxu1 }
 0x5b8   :  { %v1270_v10 = vadd.f32 %v1269_v2, %v2094_v56 }
 0x5b9   :  { %v1292_v26 = vadd.f32 %v1250_v13, %v209_v34 }
 0x5bb   :  { %v1402_v48 = vmul.f32 -1.442695, %v1292_v26 }
 0x5bc   :  { %v1229_v12 = vpop.f32.mrf.mxu3 }
 0x5bd   :  { %1495 = vpow2.f32 %v1402_v48  ;;  %v1230_v14 = vadd.f32 %v1229_v12, %v2638_v62 }
 0x5bf   :  { %v1272_v22 = vadd.f32 %v1230_v14, %v2649_v19 }
 0x5c1   :  { %v1401_v25 = vmul.f32 -1.442695, %v1272_v22 }
 0x5c3   :  { %v1496_v47 = vpop.eup %1495  ;;  %1497 = vpow2.f32 %v1401_v25 }
 0x5c4   :  { %v1296_v44 = vadd.f32 1.0, %v1496_v47 }
 0x5c6   :  { %1499 = vrcp.f32 %v1296_v44  ;;  %v1308_v21 = vand.u32 2147483648, %v1296_v44  ;;  %vm1302_vm6 = vweird.f32 %v1296_v44  ;;  %v1306_v11 = vand.u32 2147483647, %v1296_v44 }
 0x5c8   :  { %v1309_v30 = vor.u32 1.1754944e-38, %v1308_v21  ;;  %vm1307_vm8 = vcmp.eq.f32.partialorder %v1306_v11, 8.507059e+37 }
 0x5c9   :  { %v1498_v59 = vpop.eup %1497 }
 0x5ca   :  { %v1276_v3 = vadd.f32 1.0, %v1498_v59 }
 0x5cc   :  { %1501 = vrcp.f32 %v1276_v3  ;;  %v1500_v9 = vpop.eup %1499  ;;  %v1288_v55 = vand.u32 2147483648, %v1276_v3  ;;  %v1286_v62 = vand.u32 2147483647, %v1276_v3  ;;  %vm1282_vm2 = vweird.f32 %v1276_v3 }
 0x5cd   :  { %v1298_v51 = vmul.f32 %v1500_v9, %v1296_v44  ;;  %vm1303_vm5 = vweird.f32 %v1500_v9 }
 0x5ce   :  { %v1289_v4 = vor.u32 1.1754944e-38, %v1288_v55  ;;  %vm1287_vm4 = vcmp.eq.f32.partialorder %v1286_v62, 8.507059e+37  ;;  %vm1304_vm7 = vmor %vm1302_vm6, %vm1303_vm5 }
 0x5cf   :  { %v1299_v50 = vsub.f32 1.0, %v1298_v51 }
 0x5d1   :  { %v1300_v60 = vmul.f32 %v1500_v9, %v1299_v50 }
 0x5d2   :  { %v1502_v17 = vpop.eup %1501 }
 0x5d3   :  { %v1278_v1 = vmul.f32 %v1502_v17, %v1276_v3  ;;  %vm1283_vm1 = vweird.f32 %v1502_v17  ;;  %v1301_v58 = vadd.f32 %v1500_v9, %v1300_v60 }
 0x5d4   :  { %vm1284_vm3 = vmor %vm1282_vm2, %vm1283_vm1 }
 0x5d5   :  { %v1279_v46 = vsub.f32 1.0, %v1278_v1  ;;  %v1305_v7 = vsel %vm1304_vm7, %v1500_v9, %v1301_v58 }
 0x5d6   :  { %v1310_v36 = vsel %vm1307_vm8, %v1309_v30, %v1305_v7 }
 0x5d7   :  { %v1280_v57 = vmul.f32 %v1502_v17, %v1279_v46  ;;  %v1315_v56 = vsub.f32 1.0, %v1310_v36  ;;  %v1317_v61 = vmul.f32 %v1310_v36, %v2516_v43 }
 0x5d9   :  { %v1281_v5 = vadd.f32 %v1502_v17, %v1280_v57 }
 0x5db   :  { %v1285_v40 = vsel %vm1284_vm3, %v1502_v17, %v1281_v5 }
 0x5dc   :  { %v1290_v63 = vsel %vm1287_vm4, %v1289_v4, %v1285_v40 }
 0x5dd   :  { %v1312_v41 = vmul.f32 %v1290_v63, %v1270_v10 }
 0x5df   :  { %v1313_v16 = vadd.f32 %v1312_v41, %v250_v29 }
 0x5e1   :  { %1503 = vtanh.f32 %v1313_v16 }
 0x5e7   :  { %v1504_v52 = vpop.eup %1503 }
 0x5e8   :  { %v1316_v15 = vmul.f32 %v1504_v52, %v1315_v56 }
 0x5ea   :  { %v1318_v8 = vadd.f32 %v1317_v61, %v1316_v15 }
 0x5ec   :  { %v1325_v39 = vsub.f32 %v1318_v8, %v2516_v43 }
 0x5ee   :  { %v1331_v23 = vmul.f32 %v1329_v49, %v1325_v39 }
 0x5f0   :  { %v1332_v45 = vadd.f32 %v1331_v23, %v2516_v43 }
 0x5f2   :  { %1337 = vst [vmem:[#allocation10] sm:$0xff] %v1332_v45 }
 0x5f3   :  { %1348 = dma.vmem_to_hbm [thread:$0]  %s1344_s19, 128, %s1346_s22, [#allocation6]  }
 0x5f4   :  { %1654 = dma.done.wait [#allocation6], 128  }
 0x5f5   :  { %1655 = vsyncadd [#allocation6], 4294967168 }
 0x5f6   :  { %1353 = vsyncpa [#allocation5], 1 }
 0x5f7   :  { %1354 = vsyncpa [#allocation8], 1 }
 0x5f8   :  { %1355 = vsyncpa [#allocation6], 1 }

</bundles_post_ra>
